<compile_context>
chip_gen: v6e
topology: v6e:2x2x1
jax: 0.10.0
libtpu: 0.0.40
codegen_flags: <defaults>
</compile_context>

<pallas_src>
import jax
import jax.numpy as jnp
import numpy as np
from jax import lax
from jax.experimental import pallas as pl
from jax.experimental.pallas import tpu as pltpu

D_MODEL = 64          # n_embd / d_model
N_HEAD = 2
HEAD_DIM = D_MODEL // N_HEAD
N_HIDDEN = 100
N_HIDDEN_PAD = 128    # padded to a full 128-lane width (zero-padded weights; ReLU(0)=0 -> exact)
LN_EPS = 1e-5
MAX_ROWS_PER_STEP = 1024   # VMEM budget: rows * ~(192+128+5*64) f32 ≈ 2.6 MB live, fits everywhere


def _layernorm(x, gamma, beta):
    # PyTorch LayerNorm: biased variance, eps inside sqrt.
    mean = jnp.mean(x, axis=-1, keepdims=True)
    var = jnp.mean((x - mean) ** 2, axis=-1, keepdims=True)
    return (x - mean) * lax.rsqrt(var + LN_EPS) * gamma + beta


def encoder_block_kernel(
    x_ref,                    # (ROWS, C)           flattened batch*seq rows for this slab
    wqkv_ref,                 # (C, 3C)             [Q_allheads | K_allheads | V_allheads]
    wproj_ref,                # (C, C)
    w1_ref,                   # (C, HPAD)
    w2_ref,                   # (HPAD, C)
    pvec_ref,                 # (8, 128)            packed small params (single DMA)
    y_ref,                    # (ROWS, C)
    attn_ref,                 # (B_TILE, N_HEAD*T*T) lane-dense, stored k-major (transposed)
):
    ROWS, C = x_ref.shape
    BT = attn_ref.shape[0]
    T = ROWS // BT
    scale = HEAD_DIM ** (-0.5)

    # ---- unpack consolidated small parameters ----
    ln1_g = pvec_ref[0:1, :C]
    ln1_b = pvec_ref[1:2, :C]
    bproj = pvec_ref[2:3, :C]
    ln2_g = pvec_ref[3:4, :C]
    ln2_b = pvec_ref[4:5, :C]
    b1 = pvec_ref[5:6, :]          # (1, HPAD)
    b2 = pvec_ref[6:7, :C]

    xf = x_ref[...]                                  # (ROWS, C)

    # ---- LayerNorm 1 ----
    x_ln1 = _layernorm(xf, ln1_g, ln1_b)

    # ---- fused QKV projection: one lane-dense (ROWS, 3C) matmul ----
    qkv = jnp.dot(x_ln1, wqkv_ref[...], preferred_element_type=jnp.float32)

    # ---- per-head attention (static unroll, n_head = 2) ----
    head_outs = []
    attn_flat = []
    for h in range(N_HEAD):
        lo = h * HEAD_DIM
        qh = qkv[:, lo:lo + HEAD_DIM].reshape(BT, T, HEAD_DIM)
        kh = qkv[:, C + lo:C + lo + HEAD_DIM].reshape(BT, T, HEAD_DIM)
        vh = qkv[:, 2 * C + lo:2 * C + lo + HEAD_DIM].reshape(BT, T, HEAD_DIM)

        # scoresT[b, k, q] = <k_k, q_q> * scale  (transposed so softmax reduces on lanes)
        scoresT = lax.dot_general(
            kh, qh,
            dimension_numbers=(((2,), (2,)), ((0,), (0,))),
            preferred_element_type=jnp.float32) * scale          # (BT, Tk, Tq)

        # reference F.softmax(dim=1): normalize over the query axis == last axis here.
        m = jnp.max(scoresT, axis=-1, keepdims=True)
        e = jnp.exp(scoresT - m)
        attnT = e / jnp.sum(e, axis=-1, keepdims=True)            # (BT, Tk, Tq)
        attn_flat.append(attnT.reshape(BT, T * T))                # lane-dense, k-major

        # out[b,q,d] = sum_k attnT[b,k,q] * v[b,k,d]
        out_h = lax.dot_general(
            attnT, vh,
            dimension_numbers=(((1,), (1,)), ((0,), (0,))),
            preferred_element_type=jnp.float32)                   # (BT, Tq, hd)
        head_outs.append(out_h.reshape(ROWS, HEAD_DIM))

    # single lane-dense store of the (transposed, flattened) attention weights
    attn_ref[...] = jnp.concatenate(attn_flat, axis=-1)           # (BT, N_HEAD*T*T)

    # ---- fused output projection: one (ROWS, C) @ (C, C) matmul ----
    concat = jnp.concatenate(head_outs, axis=-1)                  # (ROWS, C)
    sa = jnp.dot(concat, wproj_ref[...], preferred_element_type=jnp.float32) + bproj

    # ---- residual 1 ----
    x1 = xf + sa

    # ---- LayerNorm 2 + FeedForward (hidden padded to 128) ----
    x_ln2 = _layernorm(x1, ln2_g, ln2_b)
    h1 = jnp.maximum(
        jnp.dot(x_ln2, w1_ref[...], preferred_element_type=jnp.float32) + b1, 0.0)
    ff = jnp.dot(h1, w2_ref[...], preferred_element_type=jnp.float32) + b2

    # ---- residual 2 ----
    y_ref[...] = x1 + ff


def _tpu_wants_multicore():
    """True only for generations with >1 TensorCore per chip (v7x)."""
    try:
        kind = jax.devices()[0].device_kind.lower()
    except Exception:
        return False
    return "v7" in kind


def _pick_b_tile(B, T, max_rows=MAX_ROWS_PER_STEP, prefer_multicore=False):
    """Largest divisor of B whose slab fits the VMEM budget; on multicore chips prefer
    >=2 grid steps with b_tile a multiple of 8 (keeps the (b_tile, 128) attn block legal)."""
    max_bt = max(1, max_rows // T)
    divs = [d for d in range(1, B + 1) if B % d == 0 and d <= max_bt]
    b_tile = max(divs) if divs else 1
    if prefer_multicore:
        multi = [d for d in divs if B // d >= 2 and d % 8 == 0]
        if multi:
            b_tile = max(multi)
    return b_tile


@jax.jit
def encoder_block(x, packed):
    B, T, C = x.shape
    assert C == D_MODEL
    b_tile = _pick_b_tile(B, T, prefer_multicore=_tpu_wants_multicore())
    n_blocks = B // b_tile
    rows = b_tile * T
    attn_w = N_HEAD * T * T                       # 128 lanes for T=8

    full = lambda shape: pl.BlockSpec(shape, lambda b: (0,) * len(shape))

    in_specs = [
        pl.BlockSpec((rows, C), lambda b: (b, 0)),            # x (flattened rows)
        full((C, 3 * C)),                                     # fused QKV weight
        full((C, C)),                                         # wproj
        full((C, N_HIDDEN_PAD)),                              # w1 (padded)
        full((N_HIDDEN_PAD, C)),                              # w2 (padded)
        full((8, 128)),                                       # packed small params
    ]
    out_specs = [
        pl.BlockSpec((rows, C), lambda b: (b, 0)),            # y (flattened rows)
        pl.BlockSpec((b_tile, attn_w), lambda b: (b, 0)),     # attn (lane-dense, transposed)
    ]
    out_shape = (
        jax.ShapeDtypeStruct((B * T, C), jnp.float32),
        jax.ShapeDtypeStruct((B, attn_w), jnp.float32),
    )

    flops = (2 * B * T * (3 * C * C + C * C + 2 * C * N_HIDDEN_PAD)
             + 4 * B * N_HEAD * T * T * HEAD_DIM)
    transcendentals = B * N_HEAD * T * T
    bytes_accessed = 4 * (
        2 * B * T * C + B * attn_w                           # x, y, attn
        + 3 * C * C + C * C                                  # wqkv, wproj
        + C * N_HIDDEN_PAD + N_HIDDEN_PAD * C                # w1, w2
        + 8 * 128)                                           # packed params

    y2d, attn_flat = pl.pallas_call(
        encoder_block_kernel,
        grid=(n_blocks,),
        in_specs=in_specs,
        out_specs=out_specs,
        out_shape=out_shape,
        compiler_params=pltpu.CompilerParams(
            dimension_semantics=("parallel",)),
        cost_estimate=pl.CostEstimate(
            flops=flops,
            transcendentals=transcendentals,
            bytes_accessed=bytes_accessed),
    )(
        x.reshape(B * T, C),
        packed["wqkv"], packed["wproj"], packed["w1"], packed["w2"], packed["pvec"],
    )

    y = y2d.reshape(B, T, C)
    # kernel stores attn transposed (k-major) so softmax reduces on the lane axis;
    # un-transpose here (tiny, outside the kernel).
    attn = attn_flat.reshape(B, N_HEAD, T, T).swapaxes(-1, -2)
    return y, attn


def init_params(key):
    """Unpadded parameters mirroring the PyTorch module (weights pre-transposed)."""
    ks = jax.random.split(key, 9)
    s = 0.05
    return {
        # per-head projection weights, transposed: (n_head, d_model, head_dim)
        "wq_t": jax.random.normal(ks[0], (N_HEAD, D_MODEL, HEAD_DIM), jnp.float32) * s,
        "wk_t": jax.random.normal(ks[1], (N_HEAD, D_MODEL, HEAD_DIM), jnp.float32) * s,
        "wv_t": jax.random.normal(ks[2], (N_HEAD, D_MODEL, HEAD_DIM), jnp.float32) * s,
        "wproj_t": jax.random.normal(ks[3], (D_MODEL, D_MODEL), jnp.float32) * s,
        "bproj": jax.random.normal(ks[4], (1, D_MODEL), jnp.float32) * s,
        "ln1_g": jnp.ones((1, D_MODEL), jnp.float32),
        "ln1_b": jnp.zeros((1, D_MODEL), jnp.float32),
        "ln2_g": jnp.ones((1, D_MODEL), jnp.float32),
        "ln2_b": jnp.zeros((1, D_MODEL), jnp.float32),
        "w1_t": jax.random.normal(ks[5], (D_MODEL, N_HIDDEN), jnp.float32) * s,
        "b1": jax.random.normal(ks[6], (1, N_HIDDEN), jnp.float32) * s,
        "w2_t": jax.random.normal(ks[7], (N_HIDDEN, D_MODEL), jnp.float32) * s,
        "b2": jax.random.normal(ks[8], (1, D_MODEL), jnp.float32) * s,
    }


def pack_params(p):
    """Pack/pad params for the kernel: fused QKV weight, hidden dim zero-padded to 128,
    and all 1-row bias/scale vectors consolidated into a single (8,128) block."""
    to2d = lambda w: jnp.moveaxis(w, 0, 1).reshape(D_MODEL, N_HEAD * HEAD_DIM)
    wqkv = jnp.concatenate([to2d(p["wq_t"]), to2d(p["wk_t"]), to2d(p["wv_t"])], axis=-1)
    w1 = jnp.zeros((D_MODEL, N_HIDDEN_PAD), jnp.float32).at[:, :N_HIDDEN].set(p["w1_t"])
    w2 = jnp.zeros((N_HIDDEN_PAD, D_MODEL), jnp.float32).at[:N_HIDDEN, :].set(p["w2_t"])
    pvec = jnp.zeros((8, 128), jnp.float32)
    pvec = pvec.at[0, :D_MODEL].set(p["ln1_g"][0])
    pvec = pvec.at[1, :D_MODEL].set(p["ln1_b"][0])
    pvec = pvec.at[2, :D_MODEL].set(p["bproj"][0])
    pvec = pvec.at[3, :D_MODEL].set(p["ln2_g"][0])
    pvec = pvec.at[4, :D_MODEL].set(p["ln2_b"][0])
    pvec = pvec.at[5, :N_HIDDEN].set(p["b1"][0])     # b1, zero-padded to 128
    pvec = pvec.at[6, :D_MODEL].set(p["b2"][0])
    return {"wqkv": wqkv, "wproj": p["wproj_t"], "w1": w1, "w2": w2, "pvec": pvec}


def ref_forward(x, p):
    """Pure-JAX reference mirroring the PyTorch module exactly (unpadded params)."""
    def layernorm(z, g, b):
        m = z.mean(-1, keepdims=True)
        v = ((z - m) ** 2).mean(-1, keepdims=True)
        return (z - m) / jnp.sqrt(v + LN_EPS) * g[0] + b[0]

    x_ln1 = layernorm(x, p["ln1_g"], p["ln1_b"])
    outs, attns = [], []
    for h in range(N_HEAD):
        q = x_ln1 @ p["wq_t"][h]
        k = x_ln1 @ p["wk_t"][h]
        v = x_ln1 @ p["wv_t"][h]
        scores = q @ jnp.swapaxes(k, -1, -2) * HEAD_DIM ** (-0.5)
        w = jax.nn.softmax(scores, axis=1)   # dim=1 of (B, T, T), as in the reference
        attns.append(w)
        outs.append(w @ v)
    concat = jnp.concatenate(outs, axis=-1)
    sa_out = concat @ p["wproj_t"] + p["bproj"][0]
    x1 = x + sa_out
    x_ln2 = layernorm(x1, p["ln2_g"], p["ln2_b"])
    ff = jax.nn.relu(x_ln2 @ p["w1_t"] + p["b1"][0]) @ p["w2_t"] + p["b2"][0]
    return x1 + ff, jnp.stack(attns, axis=1)


if __name__ == "__main__":
    key = jax.random.PRNGKey(0)
    k_param, k_x = jax.random.split(key)

    B, T = 4, 8
    x = jax.random.normal(k_x, (B, T, D_MODEL), jnp.float32)
    params = init_params(k_param)
    packed = pack_params(params)

    y, attn = encoder_block(x, packed)
    y, attn = jax.block_until_ready((y, attn))

    y_ref, attn_ref = ref_forward(x, params)
    assert y.shape == (B, T, D_MODEL) and attn.shape == (B, N_HEAD, T, T)
    np.testing.assert_allclose(np.asarray(y), np.asarray(y_ref), rtol=1e-5, atol=1e-5)
    np.testing.assert_allclose(np.asarray(attn), np.asarray(attn_ref), rtol=1e-5, atol=1e-5)

    print("KERNEL_OK")
</pallas_src>

<mosaic_0001>
module attributes {stable_mosaic.version = 11 : i64} {
  func.func @encoder_block_kernel(%arg0: i32, %arg1: memref<32x64xf32, #tpu.memory_space<vmem>>, %arg2: memref<64x192xf32, #tpu.memory_space<vmem>>, %arg3: memref<64x64xf32, #tpu.memory_space<vmem>>, %arg4: memref<64x128xf32, #tpu.memory_space<vmem>>, %arg5: memref<128x64xf32, #tpu.memory_space<vmem>>, %arg6: memref<8x128xf32, #tpu.memory_space<vmem>>, %arg7: memref<32x64xf32, #tpu.memory_space<vmem>>, %arg8: memref<4x128xf32, #tpu.memory_space<vmem>>) attributes {dimension_semantics = [#tpu.dimension_semantics<parallel>], iteration_bounds = array<i64: 1>, scalar_prefetch = 0 : i64, scratch_operands = 0 : i64, tpu.core_type = #tpu.core_type<tc>, window_params = [{transform_indices = @transform_0, window_bounds = array<i64: 32, 64>}, {pipeline_mode = #tpu.pipeline_mode<synchronous>, transform_indices = @transform_1, window_bounds = array<i64: 64, 192>}, {pipeline_mode = #tpu.pipeline_mode<synchronous>, transform_indices = @transform_2, window_bounds = array<i64: 64, 64>}, {pipeline_mode = #tpu.pipeline_mode<synchronous>, transform_indices = @transform_3, window_bounds = array<i64: 64, 128>}, {pipeline_mode = #tpu.pipeline_mode<synchronous>, transform_indices = @transform_4, window_bounds = array<i64: 128, 64>}, {pipeline_mode = #tpu.pipeline_mode<synchronous>, transform_indices = @transform_5, window_bounds = array<i64: 8, 128>}, {transform_indices = @transform_6, window_bounds = array<i64: 32, 64>}, {transform_indices = @transform_7, window_bounds = array<i64: 4, 128>}]} {
    %c0 = arith.constant 0 : index
    %c0_0 = arith.constant 0 : index
    %0 = vector.load %arg6[%c0, %c0_0] : memref<8x128xf32, #tpu.memory_space<vmem>>, vector<1x64xf32>
    %c1 = arith.constant 1 : index
    %c0_1 = arith.constant 0 : index
    %1 = vector.load %arg6[%c1, %c0_1] : memref<8x128xf32, #tpu.memory_space<vmem>>, vector<1x64xf32>
    %c2 = arith.constant 2 : index
    %c0_2 = arith.constant 0 : index
    %2 = vector.load %arg6[%c2, %c0_2] : memref<8x128xf32, #tpu.memory_space<vmem>>, vector<1x64xf32>
    %c3 = arith.constant 3 : index
    %c0_3 = arith.constant 0 : index
    %3 = vector.load %arg6[%c3, %c0_3] : memref<8x128xf32, #tpu.memory_space<vmem>>, vector<1x64xf32>
    %c4 = arith.constant 4 : index
    %c0_4 = arith.constant 0 : index
    %4 = vector.load %arg6[%c4, %c0_4] : memref<8x128xf32, #tpu.memory_space<vmem>>, vector<1x64xf32>
    %c5 = arith.constant 5 : index
    %c0_5 = arith.constant 0 : index
    %5 = vector.load %arg6[%c5, %c0_5] : memref<8x128xf32, #tpu.memory_space<vmem>>, vector<1x128xf32>
    %c6 = arith.constant 6 : index
    %c0_6 = arith.constant 0 : index
    %6 = vector.load %arg6[%c6, %c0_6] : memref<8x128xf32, #tpu.memory_space<vmem>>, vector<1x64xf32>
    %c0_7 = arith.constant 0 : index
    %c0_8 = arith.constant 0 : index
    %7 = vector.load %arg1[%c0_7, %c0_8] : memref<32x64xf32, #tpu.memory_space<vmem>>, vector<32x64xf32>
    %cst = arith.constant dense<0.000000e+00> : vector<32xf32>
    %8 = vector.multi_reduction <add>, %7, %cst [1] : vector<32x64xf32> to vector<32xf32>
    %9 = vector.shape_cast %8 : vector<32xf32> to vector<32x1xf32>
    %cst_9 = arith.constant 6.400000e+01 : f32
    %10 = vector.broadcast %cst_9 : f32 to vector<32x1xf32>
    %11 = arith.divf %9, %10 : vector<32x1xf32>
    %12 = vector.broadcast %11 : vector<32x1xf32> to vector<32x64xf32>
    %13 = arith.subf %7, %12 : vector<32x64xf32>
    %14 = arith.mulf %13, %13 : vector<32x64xf32>
    %cst_10 = arith.constant dense<0.000000e+00> : vector<32xf32>
    %15 = vector.multi_reduction <add>, %14, %cst_10 [1] : vector<32x64xf32> to vector<32xf32>
    %16 = vector.shape_cast %15 : vector<32xf32> to vector<32x1xf32>
    %cst_11 = arith.constant 6.400000e+01 : f32
    %17 = vector.broadcast %cst_11 : f32 to vector<32x1xf32>
    %18 = arith.divf %16, %17 : vector<32x1xf32>
    %19 = vector.broadcast %11 : vector<32x1xf32> to vector<32x64xf32>
    %20 = arith.subf %7, %19 : vector<32x64xf32>
    %cst_12 = arith.constant 9.99999974E-6 : f32
    %21 = vector.broadcast %cst_12 : f32 to vector<32x1xf32>
    %22 = arith.addf %18, %21 : vector<32x1xf32>
    %23 = math.rsqrt %22 : vector<32x1xf32>
    %24 = vector.broadcast %23 : vector<32x1xf32> to vector<32x64xf32>
    %25 = arith.mulf %20, %24 : vector<32x64xf32>
    %26 = vector.broadcast %0 : vector<1x64xf32> to vector<32x64xf32>
    %27 = arith.mulf %25, %26 : vector<32x64xf32>
    %28 = vector.broadcast %1 : vector<1x64xf32> to vector<32x64xf32>
    %29 = arith.addf %27, %28 : vector<32x64xf32>
    %c0_13 = arith.constant 0 : index
    %c0_14 = arith.constant 0 : index
    %30 = vector.load %arg2[%c0_13, %c0_14] : memref<64x192xf32, #tpu.memory_space<vmem>>, vector<64x192xf32>
    %cst_15 = arith.constant dense<0.000000e+00> : vector<32x192xf32>
    %31 = tpu.matmul %29, %30, %cst_15 {dimension_numbers = #tpu.dot_dimension_numbers<[1], [0], [0], [1], [0, 0, 1, 1], [], []>} : vector<32x64xf32>, vector<64x192xf32>, vector<32x192xf32> -> vector<32x192xf32>
    %32 = vector.extract_strided_slice %31 {offsets = [0, 0], sizes = [32, 32], strides = [1, 1]} : vector<32x192xf32> to vector<32x32xf32>
    %33 = vector.shape_cast %32 : vector<32x32xf32> to vector<4x8x32xf32>
    %34 = vector.extract_strided_slice %31 {offsets = [0, 64], sizes = [32, 32], strides = [1, 1]} : vector<32x192xf32> to vector<32x32xf32>
    %35 = vector.shape_cast %34 : vector<32x32xf32> to vector<4x8x32xf32>
    %36 = vector.extract_strided_slice %31 {offsets = [0, 128], sizes = [32, 32], strides = [1, 1]} : vector<32x192xf32> to vector<32x32xf32>
    %37 = vector.shape_cast %36 : vector<32x32xf32> to vector<4x8x32xf32>
    %cst_16 = arith.constant dense<0.000000e+00> : vector<4x8x8xf32>
    %38 = tpu.matmul %35, %33, %cst_16 {dimension_numbers = #tpu.dot_dimension_numbers<[2], [2], [1], [1], [0, 0, 0, 1, 1, 1], [0], [0]>} : vector<4x8x32xf32>, vector<4x8x32xf32>, vector<4x8x8xf32> -> vector<4x8x8xf32>
    %cst_17 = arith.constant 0.176776692 : f32
    %39 = vector.broadcast %cst_17 : f32 to vector<4x8x8xf32>
    %40 = arith.mulf %38, %39 : vector<4x8x8xf32>
    %cst_18 = arith.constant dense<0xFF800000> : vector<4x8xf32>
    %41 = vector.multi_reduction <maximumf>, %40, %cst_18 [2] : vector<4x8x8xf32> to vector<4x8xf32>
    %42 = vector.shape_cast %41 : vector<4x8xf32> to vector<4x8x1xf32>
    %43 = vector.broadcast %42 : vector<4x8x1xf32> to vector<4x8x8xf32>
    %44 = arith.subf %40, %43 : vector<4x8x8xf32>
    %45 = math.exp %44 : vector<4x8x8xf32>
    %cst_19 = arith.constant dense<0.000000e+00> : vector<4x8xf32>
    %46 = vector.multi_reduction <add>, %45, %cst_19 [2] : vector<4x8x8xf32> to vector<4x8xf32>
    %47 = vector.shape_cast %46 : vector<4x8xf32> to vector<4x8x1xf32>
    %48 = vector.broadcast %47 : vector<4x8x1xf32> to vector<4x8x8xf32>
    %49 = arith.divf %45, %48 : vector<4x8x8xf32>
    %50 = vector.shape_cast %49 : vector<4x8x8xf32> to vector<4x64xf32>
    %cst_20 = arith.constant dense<0.000000e+00> : vector<4x8x32xf32>
    %51 = tpu.matmul %49, %37, %cst_20 {dimension_numbers = #tpu.dot_dimension_numbers<[1], [1], [2], [2], [0, 0, 0, 2, 1, 2], [0], [0]>} : vector<4x8x8xf32>, vector<4x8x32xf32>, vector<4x8x32xf32> -> vector<4x8x32xf32>
    %52 = vector.shape_cast %51 : vector<4x8x32xf32> to vector<32x32xf32>
    %53 = vector.extract_strided_slice %31 {offsets = [0, 32], sizes = [32, 32], strides = [1, 1]} : vector<32x192xf32> to vector<32x32xf32>
    %54 = vector.shape_cast %53 : vector<32x32xf32> to vector<4x8x32xf32>
    %55 = vector.extract_strided_slice %31 {offsets = [0, 96], sizes = [32, 32], strides = [1, 1]} : vector<32x192xf32> to vector<32x32xf32>
    %56 = vector.shape_cast %55 : vector<32x32xf32> to vector<4x8x32xf32>
    %57 = vector.extract_strided_slice %31 {offsets = [0, 160], sizes = [32, 32], strides = [1, 1]} : vector<32x192xf32> to vector<32x32xf32>
    %58 = vector.shape_cast %57 : vector<32x32xf32> to vector<4x8x32xf32>
    %cst_21 = arith.constant dense<0.000000e+00> : vector<4x8x8xf32>
    %59 = tpu.matmul %56, %54, %cst_21 {dimension_numbers = #tpu.dot_dimension_numbers<[2], [2], [1], [1], [0, 0, 0, 1, 1, 1], [0], [0]>} : vector<4x8x32xf32>, vector<4x8x32xf32>, vector<4x8x8xf32> -> vector<4x8x8xf32>
    %cst_22 = arith.constant 0.176776692 : f32
    %60 = vector.broadcast %cst_22 : f32 to vector<4x8x8xf32>
    %61 = arith.mulf %59, %60 : vector<4x8x8xf32>
    %cst_23 = arith.constant dense<0xFF800000> : vector<4x8xf32>
    %62 = vector.multi_reduction <maximumf>, %61, %cst_23 [2] : vector<4x8x8xf32> to vector<4x8xf32>
    %63 = vector.shape_cast %62 : vector<4x8xf32> to vector<4x8x1xf32>
    %64 = vector.broadcast %63 : vector<4x8x1xf32> to vector<4x8x8xf32>
    %65 = arith.subf %61, %64 : vector<4x8x8xf32>
    %66 = math.exp %65 : vector<4x8x8xf32>
    %cst_24 = arith.constant dense<0.000000e+00> : vector<4x8xf32>
    %67 = vector.multi_reduction <add>, %66, %cst_24 [2] : vector<4x8x8xf32> to vector<4x8xf32>
    %68 = vector.shape_cast %67 : vector<4x8xf32> to vector<4x8x1xf32>
    %69 = vector.broadcast %68 : vector<4x8x1xf32> to vector<4x8x8xf32>
    %70 = arith.divf %66, %69 : vector<4x8x8xf32>
    %71 = vector.shape_cast %70 : vector<4x8x8xf32> to vector<4x64xf32>
    %cst_25 = arith.constant dense<0.000000e+00> : vector<4x8x32xf32>
    %72 = tpu.matmul %70, %58, %cst_25 {dimension_numbers = #tpu.dot_dimension_numbers<[1], [1], [2], [2], [0, 0, 0, 2, 1, 2], [0], [0]>} : vector<4x8x8xf32>, vector<4x8x32xf32>, vector<4x8x32xf32> -> vector<4x8x32xf32>
    %73 = vector.shape_cast %72 : vector<4x8x32xf32> to vector<32x32xf32>
    %74 = tpu.concatenate %50, %71 in 1 : vector<4x64xf32>, vector<4x64xf32> -> vector<4x128xf32>
    %c0_26 = arith.constant 0 : index
    %c0_27 = arith.constant 0 : index
    %75 = vector.load %arg8[%c0_26, %c0_27] : memref<4x128xf32, #tpu.memory_space<vmem>>, vector<4x128xf32>
    tpu.vector_store %arg8[%c0_26, %c0_27], %74 {strides = array<i32>} : memref<4x128xf32, #tpu.memory_space<vmem>>, vector<4x128xf32>,
    %76 = tpu.concatenate %52, %73 in 1 : vector<32x32xf32>, vector<32x32xf32> -> vector<32x64xf32>
    %c0_28 = arith.constant 0 : index
    %c0_29 = arith.constant 0 : index
    %77 = vector.load %arg3[%c0_28, %c0_29] : memref<64x64xf32, #tpu.memory_space<vmem>>, vector<64x64xf32>
    %cst_30 = arith.constant dense<0.000000e+00> : vector<32x64xf32>
    %78 = tpu.matmul %76, %77, %cst_30 {dimension_numbers = #tpu.dot_dimension_numbers<[1], [0], [0], [1], [0, 0, 1, 1], [], []>} : vector<32x64xf32>, vector<64x64xf32>, vector<32x64xf32> -> vector<32x64xf32>
    %79 = vector.broadcast %2 : vector<1x64xf32> to vector<32x64xf32>
    %80 = arith.addf %78, %79 : vector<32x64xf32>
    %81 = arith.addf %7, %80 : vector<32x64xf32>
    %cst_31 = arith.constant dense<0.000000e+00> : vector<32xf32>
    %82 = vector.multi_reduction <add>, %81, %cst_31 [1] : vector<32x64xf32> to vector<32xf32>
    %83 = vector.shape_cast %82 : vector<32xf32> to vector<32x1xf32>
    %cst_32 = arith.constant 6.400000e+01 : f32
    %84 = vector.broadcast %cst_32 : f32 to vector<32x1xf32>
    %85 = arith.divf %83, %84 : vector<32x1xf32>
    %86 = vector.broadcast %85 : vector<32x1xf32> to vector<32x64xf32>
    %87 = arith.subf %81, %86 : vector<32x64xf32>
    %88 = arith.mulf %87, %87 : vector<32x64xf32>
    %cst_33 = arith.constant dense<0.000000e+00> : vector<32xf32>
    %89 = vector.multi_reduction <add>, %88, %cst_33 [1] : vector<32x64xf32> to vector<32xf32>
    %90 = vector.shape_cast %89 : vector<32xf32> to vector<32x1xf32>
    %cst_34 = arith.constant 6.400000e+01 : f32
    %91 = vector.broadcast %cst_34 : f32 to vector<32x1xf32>
    %92 = arith.divf %90, %91 : vector<32x1xf32>
    %93 = vector.broadcast %85 : vector<32x1xf32> to vector<32x64xf32>
    %94 = arith.subf %81, %93 : vector<32x64xf32>
    %cst_35 = arith.constant 9.99999974E-6 : f32
    %95 = vector.broadcast %cst_35 : f32 to vector<32x1xf32>
    %96 = arith.addf %92, %95 : vector<32x1xf32>
    %97 = math.rsqrt %96 : vector<32x1xf32>
    %98 = vector.broadcast %97 : vector<32x1xf32> to vector<32x64xf32>
    %99 = arith.mulf %94, %98 : vector<32x64xf32>
    %100 = vector.broadcast %3 : vector<1x64xf32> to vector<32x64xf32>
    %101 = arith.mulf %99, %100 : vector<32x64xf32>
    %102 = vector.broadcast %4 : vector<1x64xf32> to vector<32x64xf32>
    %103 = arith.addf %101, %102 : vector<32x64xf32>
    %c0_36 = arith.constant 0 : index
    %c0_37 = arith.constant 0 : index
    %104 = vector.load %arg4[%c0_36, %c0_37] : memref<64x128xf32, #tpu.memory_space<vmem>>, vector<64x128xf32>
    %cst_38 = arith.constant dense<0.000000e+00> : vector<32x128xf32>
    %105 = tpu.matmul %103, %104, %cst_38 {dimension_numbers = #tpu.dot_dimension_numbers<[1], [0], [0], [1], [0, 0, 1, 1], [], []>} : vector<32x64xf32>, vector<64x128xf32>, vector<32x128xf32> -> vector<32x128xf32>
    %106 = vector.broadcast %5 : vector<1x128xf32> to vector<32x128xf32>
    %107 = arith.addf %105, %106 : vector<32x128xf32>
    %cst_39 = arith.constant 0.000000e+00 : f32
    %108 = vector.broadcast %cst_39 : f32 to vector<32x128xf32>
    %109 = arith.maximumf %107, %108 : vector<32x128xf32>
    %c0_40 = arith.constant 0 : index
    %c0_41 = arith.constant 0 : index
    %110 = vector.load %arg5[%c0_40, %c0_41] : memref<128x64xf32, #tpu.memory_space<vmem>>, vector<128x64xf32>
    %cst_42 = arith.constant dense<0.000000e+00> : vector<32x64xf32>
    %111 = tpu.matmul %109, %110, %cst_42 {dimension_numbers = #tpu.dot_dimension_numbers<[1], [0], [0], [1], [0, 0, 1, 1], [], []>} : vector<32x128xf32>, vector<128x64xf32>, vector<32x64xf32> -> vector<32x64xf32>
    %112 = vector.broadcast %6 : vector<1x64xf32> to vector<32x64xf32>
    %113 = arith.addf %111, %112 : vector<32x64xf32>
    %114 = arith.addf %81, %113 : vector<32x64xf32>
    %c0_43 = arith.constant 0 : index
    %c0_44 = arith.constant 0 : index
    %115 = vector.load %arg7[%c0_43, %c0_44] : memref<32x64xf32, #tpu.memory_space<vmem>>, vector<32x64xf32>
    tpu.vector_store %arg7[%c0_43, %c0_44], %114 {strides = array<i32>} : memref<32x64xf32, #tpu.memory_space<vmem>>, vector<32x64xf32>,
    return
  }
  func.func @transform_0(%arg0: i32) -> (i32, i32) {
    %c0_i32 = arith.constant 0 : i32
    %c0_i32_0 = arith.constant 0 : i32
    return %arg0, %c0_i32 : i32, i32
  }
  func.func @transform_1(%arg0: i32) -> (i32, i32) {
    %c0_i32 = arith.constant 0 : i32
    %c0_i32_0 = arith.constant 0 : i32
    %c0_i32_1 = arith.constant 0 : i32
    return %c0_i32, %c0_i32_0 : i32, i32
  }
  func.func @transform_2(%arg0: i32) -> (i32, i32) {
    %c0_i32 = arith.constant 0 : i32
    %c0_i32_0 = arith.constant 0 : i32
    %c0_i32_1 = arith.constant 0 : i32
    return %c0_i32, %c0_i32_0 : i32, i32
  }
  func.func @transform_3(%arg0: i32) -> (i32, i32) {
    %c0_i32 = arith.constant 0 : i32
    %c0_i32_0 = arith.constant 0 : i32
    %c0_i32_1 = arith.constant 0 : i32
    return %c0_i32, %c0_i32_0 : i32, i32
  }
  func.func @transform_4(%arg0: i32) -> (i32, i32) {
    %c0_i32 = arith.constant 0 : i32
    %c0_i32_0 = arith.constant 0 : i32
    %c0_i32_1 = arith.constant 0 : i32
    return %c0_i32, %c0_i32_0 : i32, i32
  }
  func.func @transform_5(%arg0: i32) -> (i32, i32) {
    %c0_i32 = arith.constant 0 : i32
    %c0_i32_0 = arith.constant 0 : i32
    %c0_i32_1 = arith.constant 0 : i32
    return %c0_i32, %c0_i32_0 : i32, i32
  }
  func.func @transform_6(%arg0: i32) -> (i32, i32) {
    %c0_i32 = arith.constant 0 : i32
    %c0_i32_0 = arith.constant 0 : i32
    return %arg0, %c0_i32 : i32, i32
  }
  func.func @transform_7(%arg0: i32) -> (i32, i32) {
    %c0_i32 = arith.constant 0 : i32
    %c0_i32_0 = arith.constant 0 : i32
    return %arg0, %c0_i32 : i32, i32
  }
}

</mosaic_0001>

<bundles_post_ra>
// kernel: encoder_block.1
= control target key start
LH: loop header
LB: loop body
LE: loop exit
PB: predicated region body
PF: predicated region fallthrough
CT: control target
= control target key end

     0   :  { %13 = vsyncpa [#allocation3], 0  ;;  %s3509_s0 = inlined_call_operand.hbm [shape: f32[32,64], index: 0, kind: input, shape index: {}]   ;;  %s3510_s1 = inlined_call_operand.vmem [shape: f32[64,192], index: 1, kind: input, shape index: {}]   ;;  %s3511_s2 = inlined_call_operand.vmem [shape: f32[64,64], index: 2, kind: input, shape index: {}]   ;;  %s3512_s3 = inlined_call_operand.hbm [shape: f32[64,128], index: 3, kind: input, shape index: {}]   ;;  %s3513_s4 = inlined_call_operand.vmem [shape: f32[128,64], index: 4, kind: input, shape index: {}]   ;;  %s3514_s5 = inlined_call_operand.vmem [shape: f32[8,128], index: 5, kind: input, shape index: {}]   ;;  %s3515_s6 = inlined_call_operand.hbm [shape: f32[32,64], index: 6, kind: output, shape index: {0}]   ;;  %s3516_s7 = inlined_call_operand.vmem [shape: f32[4,128], index: 7, kind: output, shape index: {1}]  }
   0x1   :  { %14 = vsyncpa [#allocation6], 0 }
   0x2   :  { %15 = vsyncpa [#allocation4], 0  ;;  %s2904_s24 = smov [#allocation2]  }
   0x3   :  { %s21_s25 = sshll.u32 %s2904_s24, 4  ;;  %s22_s25 = int_to_ptr.vmem [resolvable:$true] %s21_s25 }
   0x4   :  { %s2846_s26 = scalar_lea.vmem %s22_s25, 512  ;;  %p2851_p1 = scmp.lt.s32.totalorder %s22_s25, %s22_s25 }
   0x5   :  { %p2847_p0 = scmp.ne.s32.totalorder %s22_s25, %s2846_s26  ;;  %p2852_p2 = scmp.lt.s32.totalorder %s2846_s26, %s2846_s26 }
   0x7   :  { %p2853_p3 = por %p2852_p2, %p2851_p1 }
   0x9   :  { %p2854_p4 = pnand %p2853_p3, %p2847_p0 }
   0xb   :  { %2857 = shalt.err (!%p2854_p4)
}
   0xc   :  { %s2905_s27 = smov 128   ;;  %s2906_s28 = smov 8  }
   0xd   :  { %27 = dma.hbm_to_vmem [thread:$0]  %s3509_s0, 512, %s22_s25, [#allocation3], %s2905_s27, %s2905_s27, %s2906_s28  }
   0xe   :  { %s2907_s8 = smov [#allocation5]  }
   0xf   :  { %s37_s9 = sshll.u32 %s2907_s8, 4  ;;  %s38_s9 = int_to_ptr.vmem [resolvable:$true] %s37_s9 }
  0x10   :  { %s2866_s10 = scalar_lea.vmem %s38_s9, 1024  ;;  %p2871_p6 = scmp.lt.s32.totalorder %s38_s9, %s38_s9 }
  0x11   :  { %p2867_p5 = scmp.ne.s32.totalorder %s38_s9, %s2866_s10  ;;  %p2872_p7 = scmp.lt.s32.totalorder %s2866_s10, %s2866_s10 }
  0x13   :  { %p2873_p8 = por %p2872_p7, %p2871_p6 }
  0x15   :  { %p2874_p9 = pnand %p2873_p8, %p2867_p5 }
  0x17   :  { %2877 = shalt.err (!%p2874_p9)
}
  0x18   :  { %43 = dma.hbm_to_vmem [thread:$0]  %s3512_s3, 1024, %s38_s9, [#allocation6], %s2905_s27, %s2905_s27, %s2906_s28  }
  0x19   :  { %2898 = dma.done.wait [#allocation3], 512  }
  0x1a   :  { %2899 = vsyncadd [#allocation3], 4294966784 }
  0x1b   :  { %2900 = dma.done.wait [#allocation6], 1024  }
  0x1c   :  { %2901 = vsyncadd [#allocation6], 4294966272  ;;  %vm65_vm0 = vcmask 523264   ;;  %v2973_v0 = vld [vmem:[#allocation2] sm:$0xff]  ;;  %v2975_v1 = vld [vmem:[#allocation2 + $0x10] sm:$0xff]  ;;  %v2908_v36 = vmov 0.0  }
  0x1d   :  { %v2977_v2 = vld [vmem:[#allocation2 + $0x8] sm:$0xff]  ;;  %v66_v3 = vsel %vm65_vm0, %v2973_v0, 0.0  ;;  %v72_v4 = vsel %vm65_vm0, %v2975_v1, 0.0  ;;  %v2983_v5 = vld [vmem:[#allocation2 + $0x18] sm:$0xff]  ;;  %v149_v29 = vld [vmem:[%s3510_s1 + $0x70] sm:$0xff]  ;;  %227 = vmatprep.mubr.f32.mxu0 %v2908_v36  ;;  %2611 = vmatprep.subr.mxu1 %v2908_v36  ;;  %vm2909_vm1 = vmmov 0  }
  0x1e   :  { %67 = vadd.xlane.f32.xlu0 %v66_v3  ;;  %73 = vadd.xlane.f32.xlu1 %v72_v4  ;;  %v69_v6 = vsel %vm65_vm0, %v2977_v2, 0.0  ;;  %v75_v7 = vsel %vm65_vm0, %v2983_v5, 0.0  ;;  %v150_v28 = vld [vmem:[%s3510_s1 + $0x78] sm:$0xff]  ;;  %v148_v30 = vld [vmem:[%s3510_s1 + $0x68] sm:$0xff]  ;;  %v147_v31 = vld [vmem:[%s3510_s1 + $0x60] sm:$0xff]  ;;  %vm255_vm2 = vcmask 261120  }
  0x1f   :  { %179 = vmatprep.subr.mxu0 %v150_v28  ;;  %v146_v32 = vld [vmem:[%s3510_s1 + $0x58] sm:$0xff]  ;;  %v145_v33 = vld [vmem:[%s3510_s1 + $0x50] sm:$0xff]  ;;  %v144_v34 = vld [vmem:[%s3510_s1 + $0x48] sm:$0xff]  ;;  %2613 = vmatprep.mubr.msk.f32.mxu1 %vm2909_vm1, %v2908_v36  ;;  %s2910_s23 = smov 64   ;;  %vm565_vm3 = vcmask 64512   ;;  %s2911_s24 = smov 96  }
  0x20   :  { %180 = vmatpush1.msra.mxu0 %v149_v29  ;;  %v143_v35 = vld [vmem:[%s3510_s1 + $0x40] sm:$0xff]  ;;  %v142_v37 = vld [vmem:[%s3510_s1 + $0x38] sm:$0xff]  ;;  %v141_v38 = vld [vmem:[%s3510_s1 + $0x30] sm:$0xff]  ;;  %s2912_s25 = smov 32   ;;  %s2916_s20 = smov 24   ;;  %vm707_vm4 = vcmask 130048  }
  0x21   :  { %181 = vmatprep.subr.mxu0 %v148_v30  ;;  %v140_v39 = vld [vmem:[%s3510_s1 + $0x28] sm:$0xff]  ;;  %v139_v40 = vld [vmem:[%s3510_s1 + $0x20] sm:$0xff]  ;;  %v138_v41 = vld [vmem:[%s3510_s1 + $0x18] sm:$0xff]  ;;  %s2917_s21 = smov 48   ;;  %s2918_s22 = smov 40   ;;  %vm709_vm5 = vcmask 195584  }
  0x22   :  { %70 = vadd.xlane.f32.xlu0 %v69_v6  ;;  %76 = vadd.xlane.f32.xlu1 %v75_v7  ;;  %v137_v42 = vld [vmem:[%s3510_s1 + $0x10] sm:$0xff]  ;;  %v136_v43 = vld [vmem:[%s3510_s1 + $0x8] sm:$0xff]  ;;  %v135_v44 = vld [vmem:[%s3510_s1] sm:$0xff]  ;;  %s2915_s1 = smov 16   ;;  %vm712_vm6 = vcmask 326656   ;;  %vm714_vm7 = vcmask 392192  }
  0x23   :  { %182 = vmatpush1.msra.mxu0 %v147_v31  ;;  %v2492_v58 = vld [vmem:[%s3514_s5] ss:$0 sm:$0xff]  ;;  %v2493_v60 = vld [vmem:[%s3514_s5 + $0x1] ss:$0 sm:$0xff]  ;;  %vm716_vm8 = vcmask 457728   ;;  %s2920_s17 = smov [#allocation7]  }
  0x24   :  { %183 = vmatprep.subr.mxu0 %v146_v32  ;;  %s2475_s18 = sshll.u32 %s2920_s17, 4  ;;  %s2476_s18 = int_to_ptr.vmem [resolvable:$true] %s2475_s18 }
  0x25   :  { %184 = vmatpush1.msra.mxu0 %v145_v33  ;;  %p2883_p11 = scmp.lt.s32.totalorder %s2476_s18, %s2476_s18 }
  0x26   :  { %185 = vmatprep.subr.mxu0 %v144_v34 }
  0x27   :  { %186 = vmatpush1.msra.mxu0 %v143_v35 }
  0x28   :  { %187 = vmatprep.subr.mxu0 %v142_v37 }
  0x29   :  { %188 = vmatpush1.msra.mxu0 %v141_v38 }
  0x2a   :  { %189 = vmatprep.subr.mxu0 %v140_v39 }
  0x2b   :  { %190 = vmatpush1.msra.mxu0 %v139_v40 }
  0x2c   :  { %191 = vmatprep.subr.mxu0 %v138_v41 }
  0x2d   :  { %192 = vmatpush1.msra.mxu0 %v137_v42 }
  0x2e   :  { %193 = vmatprep.subr.mxu0 %v136_v43 }
  0x2f   :  { %194 = vmatpush1.msra.mxu0 %v135_v44 }
  0x30   :  { %2646 = vmatprep.subr.mxu0 %v2908_v36 }
  0xa7   :  { %v68_v8 = vpop.xlane.xlu0 %67  ;;  %v74_v9 = vpop.xlane.xlu1 %73 }
  0xa8   :  { %v79_v10 = vmul.f32 0.015625, %v68_v8  ;;  %v81_v11 = vmul.f32 0.015625, %v74_v9 }
  0xaa   :  { %v2990_v12 = vsub.f32 %v2973_v0, %v79_v10  ;;  %v2993_v13 = vsub.f32 %v2975_v1, %v81_v11 }
  0xab   :  { %v71_v14 = vpop.xlane.xlu0 %70  ;;  %v77_v15 = vpop.xlane.xlu1 %76 }
  0xac   :  { %v80_v16 = vmul.f32 0.015625, %v71_v14  ;;  %v82_v17 = vmul.f32 0.015625, %v77_v15  ;;  %v87_v18 = vmul.f32 %v2990_v12, %v2990_v12  ;;  %v89_v19 = vmul.f32 %v2993_v13, %v2993_v13 }
  0xae   :  { %v3000_v20 = vsub.f32 %v2977_v2, %v80_v16  ;;  %v3003_v21 = vsub.f32 %v2983_v5, %v82_v17  ;;  %v91_v22 = vsel %vm65_vm0, %v87_v18, 0.0  ;;  %v97_v23 = vsel %vm65_vm0, %v89_v19, 0.0 }
  0xaf   :  { %92 = vadd.xlane.f32.xlu0 %v91_v22 }
  0xb0   :  { %v88_v24 = vmul.f32 %v3000_v20, %v3000_v20  ;;  %v90_v25 = vmul.f32 %v3003_v21, %v3003_v21 }
  0xb2   :  { %v94_v26 = vsel %vm65_vm0, %v88_v24, 0.0  ;;  %v100_v27 = vsel %vm65_vm0, %v90_v25, 0.0 }
  0xb3   :  { %98 = vadd.xlane.f32.xlu0 %v97_v23  ;;  %95 = vadd.xlane.f32.xlu1 %v94_v26 }
  0xb7   :  { %101 = vadd.xlane.f32.xlu1 %v100_v27 }
 0x138   :  { %v93_v45 = vpop.xlane.xlu0 %92 }
 0x139   :  { %v103_v46 = vmul.f32 0.015625, %v93_v45 }
 0x13b   :  { %v107_v47 = vadd.f32 1e-05, %v103_v46 }
 0x13c   :  { %v96_v48 = vpop.xlane.xlu1 %95  ;;  %v99_v49 = vpop.xlane.xlu0 %98 }
 0x13d   :  { %2790 = vrsqrt.f32 %v107_v47  ;;  %v104_v50 = vmul.f32 0.015625, %v96_v48  ;;  %v105_v51 = vmul.f32 0.015625, %v99_v49 }
 0x13f   :  { %v108_v52 = vadd.f32 1e-05, %v104_v50  ;;  %v109_v53 = vadd.f32 1e-05, %v105_v51 }
 0x140   :  { %v102_v54 = vpop.xlane.xlu1 %101 }
 0x141   :  { %2792 = vrsqrt.f32 %v108_v52  ;;  %v106_v55 = vmul.f32 0.015625, %v102_v54 }
 0x142   :  { %2794 = vrsqrt.f32 %v109_v53 }
 0x143   :  { %v110_v56 = vadd.f32 1e-05, %v106_v55 }
 0x145   :  { %2796 = vrsqrt.f32 %v110_v56 }
 0x14a   :  { %v2791_v57 = vpop.eup %2790 }
 0x14b   :  { %v115_v59 = vmul.f32 %v2791_v57, %v2990_v12 }
 0x14d   :  { %v123_v61 = vmul.f32 %v2492_v58, %v115_v59 }
 0x14e   :  { %v2793_v62 = vpop.eup %2792 }
 0x14f   :  { %v2795_v63 = vpop.eup %2794  ;;  %v131_v3 = vadd.f32 %v2493_v60, %v123_v61  ;;  %v116_v4 = vmul.f32 %v2793_v62, %v3000_v20 }
 0x150   :  { %v117_v6 = vmul.f32 %v2795_v63, %v2993_v13 }
 0x151   :  { %2494 = vmatmul.mubr.msk.f32.vlgmr.msra.gmra.mxu0 %vm65_vm0, %v131_v3  ;;  %v124_v7 = vmul.f32 %v2492_v58, %v116_v4 }
 0x152   :  { %v2797_v8 = vpop.eup %2796  ;;  %233 = vmatprep.mubr.f32.mxu0 %v2908_v36  ;;  %v125_v10 = vmul.f32 %v2492_v58, %v117_v6 }
 0x153   :  { %v132_v9 = vadd.f32 %v2493_v60, %v124_v7  ;;  %v118_v11 = vmul.f32 %v2797_v8, %v3003_v21 }
 0x154   :  { %v133_v12 = vadd.f32 %v2493_v60, %v125_v10 }
 0x155   :  { %2495 = vmatmul.mubr.msk.f32.gmra.mxu0 %vm65_vm0, %v132_v9  ;;  %v126_v14 = vmul.f32 %v2492_v58, %v118_v11 }
 0x156   :  { %239 = vmatprep.mubr.f32.mxu0 %v2908_v36 }
 0x157   :  { %v134_v13 = vadd.f32 %v2493_v60, %v126_v14 }
 0x159   :  { %2496 = vmatmul.mubr.msk.f32.gmra.mxu0 %vm65_vm0, %v133_v12 }
 0x15a   :  { %245 = vmatprep.mubr.f32.mxu0 %v2908_v36 }
 0x15d   :  { %2497 = vmatmul.mubr.msk.f32.gmra.mxu0 %vm65_vm0, %v134_v13 }
 0x15e   :  { %2648 = vmatprep.mubr.msk.f32.mxu0 %vm2909_vm1, %v2908_v36 }
 0x211   :  { %v3085_v15 = vpop.f32.mrf.mxu0 }
 0x212   :  { %253 = vrot.lane.b32.xlu0 %v3085_v15, %s2910_s23  ;;  %2612 = vmatpush3.xpose.msk.msra.mxu1 %vm255_vm2, %v3085_v15 }
 0x213   :  { %v3091_v16 = vpop.f32.mrf.mxu0  ;;  %2616 = vmatprep.subr.mxu1 %v2908_v36 }
 0x215   :  { %v3094_v17 = vpop.f32.mrf.mxu0 }
 0x216   :  { %331 = vrot.lane.b32.xlu1 %v3094_v17, %s2910_s23 }
 0x217   :  { %v3098_v18 = vpop.f32.mrf.mxu0 }
 0x219   :  { %v3100_v19 = vpop.f32.mrf.mxu0 }
 0x21a   :  { %408 = vrot.lane.b32.xlu1 %v3100_v19, %s2910_s23 }
 0x21b   :  { %v3104_v20 = vpop.f32.mrf.mxu0 }
 0x21d   :  { %v3106_v21 = vpop.f32.mrf.mxu0 }
 0x21e   :  { %485 = vrot.lane.b32.xlu1 %v3106_v21, %s2910_s23 }
 0x21f   :  { %v3110_v22 = vpop.f32.mrf.mxu0 }
 0x220   :  { %2647 = vmatpush3.msra.mxu0 %v3110_v22 }
 0x221   :  { %2656 = vmatprep.subr.mxu0 %v2908_v36 }
 0x284   :  { %v254_v23 = vpop.permute.xlu0 %253 }
 0x285   :  { %2614 = vmatmul.mubr.msk.f32.vlgmr.msra.gmra.mxu1 %vm255_vm2, %v254_v23  ;;  %v2913_v23 = vmov 1983009808  }
 0x286   :  { %2617 = vmatpush3.xpose.msk.msra.mxu1 %vm255_vm2, %v3094_v17  ;;  %2618 = vmatprep.mubr.msk.f32.mxu1 %vm2909_vm1, %v2908_v36 }
 0x287   :  { %2621 = vmatprep.subr.mxu1 %v2908_v36 }
 0x288   :  { %v332_v24 = vpop.permute.xlu1 %331 }
 0x289   :  { %2619 = vmatmul.mubr.msk.f32.vlgmr.msra.gmra.mxu1 %vm255_vm2, %v332_v24  ;;  %v613_v24 = vunpack.c.l.s4 %v2913_v23 }
 0x28a   :  { %2622 = vmatpush3.xpose.msk.msra.mxu1 %vm255_vm2, %v3100_v19  ;;  %2623 = vmatprep.mubr.msk.f32.mxu1 %vm2909_vm1, %v2908_v36 }
 0x28b   :  { %2626 = vmatprep.subr.mxu1 %v2908_v36 }
 0x28c   :  { %v409_v25 = vpop.permute.xlu1 %408 }
 0x28d   :  { %2624 = vmatmul.mubr.msk.f32.vlgmr.msra.gmra.mxu1 %vm255_vm2, %v409_v25  ;;  %v615_v25 = vlaneseq }
 0x28e   :  { %2627 = vmatpush3.xpose.msk.msra.mxu1 %vm255_vm2, %v3106_v21  ;;  %2628 = vmatprep.mubr.msk.f32.mxu1 %vm2909_vm1, %v2908_v36 }
 0x28f   :  { %2631 = vmatprep.subr.mxu1 %v2908_v36 }
 0x290   :  { %v486_v26 = vpop.permute.xlu1 %485 }
 0x291   :  { %2629 = vmatmul.mubr.msk.f32.vlgmr.msra.gmra.mxu1 %vm255_vm2, %v486_v26  ;;  %v614_v26 = vunpack.c.0.s8 %v613_v24 }
 0x292   :  { %2632 = vmatpush3.msra.mxu1 %v3091_v16  ;;  %2633 = vmatprep.mubr.msk.f32.mxu1 %vm2909_vm1, %v2908_v36 }
 0x293   :  { %2636 = vmatprep.subr.mxu1 %v2908_v36 }
 0x345   :  { %v326_v27 = vpop.f32.mrf.mxu1 }
 0x346   :  { %v561_v28 = vmul.f32 0.17677669, %v326_v27  ;;  %v3161_v27 = vshrl.u32 %v615_v25, 7 }
 0x347   :  { %v2615_v29 = vpop.f32.mrf.mxu1 }
 0x348   :  { %v566_v30 = vsel %vm565_vm3, %v561_v28, -inf }
 0x349   :  { %567 = vmax.xlane.f32.xlu0 %v566_v30  ;;  %v403_v31 = vpop.f32.mrf.mxu1  ;;  %v3164_v30 = vsub.s32 %v614_v26, %v3161_v27 }
 0x34a   :  { %v562_v32 = vmul.f32 0.17677669, %v403_v31 }
 0x34b   :  { %v2620_v33 = vpop.f32.mrf.mxu1 }
 0x34c   :  { %v569_v34 = vsel %vm565_vm3, %v562_v32, -inf }
 0x34d   :  { %v480_v35 = vpop.f32.mrf.mxu1  ;;  %570 = vmax.xlane.f32.xlu1 %v569_v34 }
 0x34e   :  { %v563_v37 = vmul.f32 0.17677669, %v480_v35 }
 0x34f   :  { %v2625_v38 = vpop.f32.mrf.mxu1 }
 0x350   :  { %v572_v39 = vsel %vm565_vm3, %v563_v37, -inf }
 0x351   :  { %573 = vmax.xlane.f32.xlu0 %v572_v39  ;;  %v557_v40 = vpop.f32.mrf.mxu1 }
 0x352   :  { %v564_v41 = vmul.f32 0.17677669, %v557_v40 }
 0x353   :  { %v2630_v42 = vpop.f32.mrf.mxu1 }
 0x354   :  { %v575_v43 = vsel %vm565_vm3, %v564_v41, -inf }
 0x355   :  { %576 = vmax.xlane.f32.xlu0 %v575_v43 }
 0x3d2   :  { %v568_v44 = vpop.xlane.xlu0 %567 }
 0x3d3   :  { %v578_v45 = vsub.f32 %v561_v28, %v568_v44 }
 0x3d5   :  { %v582_v46 = vmul.f32 1.442695, %v578_v45 }
 0x3d6   :  { %v571_v47 = vpop.xlane.xlu1 %570 }
 0x3d7   :  { %2798 = vpow2.f32 %v582_v46  ;;  %v579_v48 = vsub.f32 %v562_v32, %v571_v47 }
 0x3d9   :  { %v584_v49 = vmul.f32 1.442695, %v579_v48 }
 0x3da   :  { %v574_v50 = vpop.xlane.xlu0 %573 }
 0x3db   :  { %2800 = vpow2.f32 %v584_v49  ;;  %v580_v51 = vsub.f32 %v563_v37, %v574_v50 }
 0x3dd   :  { %v586_v52 = vmul.f32 1.442695, %v580_v51 }
 0x3de   :  { %v577_v59 = vpop.xlane.xlu0 %576 }
 0x3df   :  { %2802 = vpow2.f32 %v586_v52  ;;  %v581_v60 = vsub.f32 %v564_v41, %v577_v59 }
 0x3e1   :  { %v588_v61 = vmul.f32 1.442695, %v581_v60 }
 0x3e3   :  { %2804 = vpow2.f32 %v588_v61 }
 0x3e4   :  { %v2799_v53 = vpop.eup %2798 }
 0x3e5   :  { %v590_v54 = vsel %vm565_vm3, %v2799_v53, 0.0 }
 0x3e6   :  { %591 = vadd.xlane.f32.xlu0 %v590_v54 }
 0x3e8   :  { %v2801_v55 = vpop.eup %2800 }
 0x3e9   :  { %v593_v56 = vsel %vm565_vm3, %v2801_v55, 0.0 }
 0x3ea   :  { %594 = vadd.xlane.f32.xlu1 %v593_v56 }
 0x3ec   :  { %v2803_v57 = vpop.eup %2802 }
 0x3ed   :  { %v596_v58 = vsel %vm565_vm3, %v2803_v57, 0.0 }
 0x3ee   :  { %597 = vadd.xlane.f32.xlu0 %v596_v58 }
 0x3f0   :  { %v2805_v62 = vpop.eup %2804 }
 0x3f1   :  { %v599_v63 = vsel %vm565_vm3, %v2805_v62, 0.0 }
 0x3fb   :  { %1218 = vrot.lane.b32.xlu1 %v3094_v17, %s2911_s24 }
 0x3ff   :  { %1138 = vrot.lane.b32.xlu1 %v3085_v15, %s2912_s25 }
 0x403   :  { %1216 = vrot.lane.b32.xlu1 %v3094_v17, %s2912_s25 }
 0x404   :  { %1140 = vrot.lane.b32.xlu0 %v3085_v15, %s2911_s24 }
 0x408   :  { %1296 = vrot.lane.b32.xlu0 %v3100_v19, %s2911_s24 }
 0x40c   :  { %1294 = vrot.lane.b32.xlu0 %v3100_v19, %s2912_s25 }
 0x427   :  { %600 = vadd.xlane.f32.xlu1 %v599_v63 }
 0x438   :  { %1374 = vrot.lane.b32.xlu1 %v3106_v21, %s2911_s24 }
 0x43c   :  { %1372 = vrot.lane.b32.xlu1 %v3106_v21, %s2912_s25 }
 0x46f   :  { %v592_v3 = vpop.xlane.xlu0 %591 }
 0x470   :  { %2806 = vrcp.f32 %v592_v3 }
 0x473   :  { %v595_v4 = vpop.xlane.xlu1 %594 }
 0x474   :  { %2808 = vrcp.f32 %v595_v4 }
 0x477   :  { %v598_v6 = vpop.xlane.xlu0 %597  ;;  %v1219_v15 = vpop.permute.xlu1 %1218 }
 0x478   :  { %2810 = vrcp.f32 %v598_v6 }
 0x47b   :  { %v1139_v17 = vpop.permute.xlu1 %1138  ;;  %v1141_v42 = vpop.permute.xlu0 %1140 }
 0x47d   :  { %v2807_v7 = vpop.eup %2806 }
 0x47e   :  { %v603_v8 = vmul.f32 %v2807_v7, %v2799_v53 }
 0x47f   :  { %v1217_v19 = vpop.permute.xlu1 %1216  ;;  %v1297_v43 = vpop.permute.xlu0 %1296 }
 0x480   :  { %718 = vxpose.xlu0.b32.start.end [1/1] (short) (narrow) %v603_v8, 8 }
 0x481   :  { %v2809_v9 = vpop.eup %2808 }
 0x482   :  { %v605_v10 = vmul.f32 %v2809_v9, %v2801_v55 }
 0x483   :  { %v1295_v45 = vpop.permute.xlu0 %1294 }
 0x484   :  { %823 = vxpose.xlu1.b32.start.end [1/1] (short) (narrow) %v605_v10, 8 }
 0x485   :  { %v2811_v11 = vpop.eup %2810 }
 0x486   :  { %v607_v12 = vmul.f32 %v2811_v11, %v2803_v57 }
 0x488   :  { %928 = vxpose.xlu0.b32.start.end [1/1] (short) (narrow) %v607_v12, 8  ;;  %v610_v14 = vcombine.low %v603_v8, %v607_v12  ;;  %v611_v13 = vcombine.high %v603_v8, %v607_v12 }
 0x48a   :  { %v3167_v33 = vrot.slane %v610_v14, %v3164_v30  ;;  %v3173_v35 = vrot.slane %v611_v13, %v3164_v30 }
 0x4b0   :  { %v601_v21 = vpop.xlane.xlu1 %600 }
 0x4b1   :  { %2812 = vrcp.f32 %v601_v21 }
 0x4b4   :  { %v1375_v44 = vpop.permute.xlu1 %1374 }
 0x4b8   :  { %v1373_v46 = vpop.permute.xlu1 %1372 }
 0x4be   :  { %v2813_v28 = vpop.eup %2812 }
 0x4bf   :  { %v609_v29 = vmul.f32 %v2813_v28, %v2805_v62 }
 0x4c1   :  { %v626_v31 = vcombine.low %v605_v10, %v609_v29  ;;  %v627_v32 = vcombine.high %v605_v10, %v609_v29  ;;  %1033 = vxpose.xlu0.b32.start.end [1/1] (short) (narrow) %v609_v29, 8 }
 0x4c3   :  { %v3170_v34 = vrot.slane %v626_v31, %v3164_v30  ;;  %v3176_v37 = vrot.slane %v627_v32, %v3164_v30 }
 0x4c5   :  { %v643_v38 = vcombine.high %v3167_v33, %v3170_v34  ;;  %v642_v39 = vcombine.low %v3167_v33, %v3170_v34  ;;  %v658_v40 = vcombine.low %v3173_v35, %v3176_v37  ;;  %v659_v41 = vcombine.high %v3173_v35, %v3176_v37  ;;  %v2244_v34 = vld [vmem:[#allocation5] sm:$0xff] }
 0x4fc   :  { %v734_v47 = vpop.trf.xlu0 }
 0x4fd   :  { %2634 = vmatmul.mubr.msk.f32.vlgmr.msra.gmra.mxu1 %vm565_vm3, %v734_v47 }
 0x4fe   :  { %2637 = vmatpush3.msra.mxu1 %v3098_v18  ;;  %2638 = vmatprep.mubr.msk.f32.mxu1 %vm2909_vm1, %v2908_v36 }
 0x4ff   :  { %2641 = vmatprep.subr.mxu1 %v2908_v36 }
 0x500   :  { %v839_v48 = vpop.trf.xlu1 }
 0x501   :  { %2639 = vmatmul.mubr.msk.f32.vlgmr.msra.gmra.mxu1 %vm565_vm3, %v839_v48 }
 0x502   :  { %2642 = vmatpush3.msra.mxu1 %v3104_v20  ;;  %2643 = vmatprep.mubr.msk.f32.mxu1 %vm2909_vm1, %v2908_v36 }
 0x503   :  { %2651 = vmatprep.subr.mxu1 %v2908_v36 }
 0x504   :  { %v944_v49 = vpop.trf.xlu0 }
 0x505   :  { %2644 = vmatmul.mubr.msk.f32.vlgmr.msra.gmra.mxu1 %vm565_vm3, %v944_v49 }
 0x506   :  { %2652 = vmatpush3.xpose.msk.msra.mxu1 %vm255_vm2, %v1141_v42  ;;  %2653 = vmatprep.mubr.msk.f32.mxu1 %vm2909_vm1, %v2908_v36 }
 0x507   :  { %2661 = vmatprep.subr.mxu1 %v2908_v36 }
 0x509   :  { %2654 = vmatmul.mubr.msk.f32.vlgmr.msra.gmra.mxu1 %vm255_vm2, %v1139_v17 }
 0x50a   :  { %2662 = vmatpush3.xpose.msk.msra.mxu1 %vm255_vm2, %v1297_v43  ;;  %2663 = vmatprep.mubr.msk.f32.mxu1 %vm2909_vm1, %v2908_v36 }
 0x50b   :  { %2671 = vmatprep.subr.mxu1 %v2908_v36 }
 0x50d   :  { %2664 = vmatmul.mubr.msk.f32.vlgmr.msra.gmra.mxu1 %vm255_vm2, %v1295_v45 }
 0x50e   :  { %2673 = vmatprep.mubr.msk.f32.mxu1 %vm2909_vm1, %v2908_v36 }
 0x53d   :  { %v1049_v50 = vpop.trf.xlu0 }
 0x53e   :  { %2649 = vmatmul.mubr.msk.f32.vlgmr.msra.gmra.mxu0 %vm565_vm3, %v1049_v50 }
 0x53f   :  { %2657 = vmatpush3.xpose.msk.msra.mxu0 %vm255_vm2, %v1219_v15  ;;  %2658 = vmatprep.mubr.msk.f32.mxu0 %vm2909_vm1, %v2908_v36 }
 0x540   :  { %2666 = vmatprep.subr.mxu0 %v2908_v36 }
 0x542   :  { %2659 = vmatmul.mubr.msk.f32.vlgmr.msra.gmra.mxu0 %vm255_vm2, %v1217_v19 }
 0x543   :  { %2667 = vmatpush3.xpose.msk.msra.mxu0 %vm255_vm2, %v1375_v44  ;;  %2668 = vmatprep.mubr.msk.f32.mxu0 %vm2909_vm1, %v2908_v36 }
 0x544   :  { %2676 = vmatprep.subr.mxu0 %v2908_v36 }
 0x546   :  { %2669 = vmatmul.mubr.msk.f32.vlgmr.msra.gmra.mxu0 %vm255_vm2, %v1373_v46 }
 0x547   :  { %2678 = vmatprep.mubr.msk.f32.mxu0 %vm2909_vm1, %v2908_v36 }
 0x5bd   :  { %v3222_v51 = vpop.f32.mrf.mxu1 }
 0x5bf   :  { %v2635_v52 = vpop.f32.mrf.mxu1 }
 0x5c1   :  { %v3224_v53 = vpop.f32.mrf.mxu1 }
 0x5c3   :  { %v2640_v54 = vpop.f32.mrf.mxu1 }
 0x5c5   :  { %v3226_v55 = vpop.f32.mrf.mxu1 }
 0x5c7   :  { %v2645_v56 = vpop.f32.mrf.mxu1 }
 0x5c9   :  { %v1212_v57 = vpop.f32.mrf.mxu1 }
 0x5ca   :  { %v1450_v58 = vmul.f32 0.17677669, %v1212_v57 }
 0x5cb   :  { %v2655_v59 = vpop.f32.mrf.mxu1 }
 0x5cc   :  { %v1454_v60 = vsel %vm565_vm3, %v1450_v58, -inf }
 0x5cd   :  { %1455 = vmax.xlane.f32.xlu0 %v1454_v60  ;;  %v1368_v61 = vpop.f32.mrf.mxu1 }
 0x5ce   :  { %v1452_v62 = vmul.f32 0.17677669, %v1368_v61 }
 0x5cf   :  { %v2665_v63 = vpop.f32.mrf.mxu1 }
 0x5d0   :  { %v1460_v3 = vsel %vm565_vm3, %v1452_v62, -inf }
 0x5d1   :  { %1461 = vmax.xlane.f32.xlu0 %v1460_v3 }
 0x5fe   :  { %v3230_v4 = vpop.f32.mrf.mxu0 }
 0x600   :  { %v2650_v6 = vpop.f32.mrf.mxu0 }
 0x602   :  { %v1290_v7 = vpop.f32.mrf.mxu0 }
 0x603   :  { %v1451_v8 = vmul.f32 0.17677669, %v1290_v7 }
 0x604   :  { %v2660_v9 = vpop.f32.mrf.mxu0 }
 0x605   :  { %v1457_v10 = vsel %vm565_vm3, %v1451_v8, -inf }
 0x606   :  { %1458 = vmax.xlane.f32.xlu1 %v1457_v10  ;;  %v1446_v11 = vpop.f32.mrf.mxu0 }
 0x607   :  { %v1453_v12 = vmul.f32 0.17677669, %v1446_v11 }
 0x608   :  { %v2670_v14 = vpop.f32.mrf.mxu0 }
 0x609   :  { %v1463_v13 = vsel %vm565_vm3, %v1453_v12, -inf }
 0x60a   :  { %1464 = vmax.xlane.f32.xlu1 %v1463_v13 }
 0x656   :  { %v1456_v15 = vpop.xlane.xlu0 %1455 }
 0x657   :  { %v1466_v17 = vsub.f32 %v1450_v58, %v1456_v15 }
 0x659   :  { %v1470_v19 = vmul.f32 1.442695, %v1466_v17 }
 0x65a   :  { %v1462_v21 = vpop.xlane.xlu0 %1461 }
 0x65b   :  { %2814 = vpow2.f32 %v1470_v19  ;;  %v1468_v23 = vsub.f32 %v1452_v62, %v1462_v21 }
 0x65d   :  { %v1474_v24 = vmul.f32 1.442695, %v1468_v23 }
 0x65f   :  { %2816 = vpow2.f32 %v1474_v24 }
 0x668   :  { %v2815_v25 = vpop.eup %2814 }
 0x669   :  { %v1478_v26 = vsel %vm565_vm3, %v2815_v25, 0.0 }
 0x66a   :  { %1479 = vadd.xlane.f32.xlu0 %v1478_v26  ;;  %v2069_v26 = vld [vmem:[%s3511_s2 + $0x30] sm:$0xff] }
 0x66c   :  { %v2817_v28 = vpop.eup %2816 }
 0x66d   :  { %v1484_v29 = vsel %vm565_vm3, %v2817_v28, 0.0 }
 0x66e   :  { %1485 = vadd.xlane.f32.xlu0 %v1484_v29  ;;  %v2067_v29 = vld [vmem:[%s3511_s2 + $0x20] sm:$0xff] }
 0x684   :  { %1634 = vrot.lane.b32.xlu0 %v3091_v16, %s2911_s24 }
 0x68f   :  { %v1459_v31 = vpop.xlane.xlu1 %1458 }
 0x690   :  { %v1467_v32 = vsub.f32 %v1451_v8, %v1459_v31  ;;  %v2066_v31 = vld [vmem:[%s3511_s2 + $0x18] sm:$0xff] }
 0x692   :  { %v1472_v42 = vmul.f32 1.442695, %v1467_v32  ;;  %v2065_v32 = vld [vmem:[%s3511_s2 + $0x10] sm:$0xff] }
 0x693   :  { %v1465_v43 = vpop.xlane.xlu1 %1464 }
 0x694   :  { %2818 = vpow2.f32 %v1472_v42  ;;  %v1469_v44 = vsub.f32 %v1453_v12, %v1465_v43  ;;  %v2064_v42 = vld [vmem:[%s3511_s2 + $0x8] sm:$0xff] }
 0x696   :  { %v1476_v45 = vmul.f32 1.442695, %v1469_v44  ;;  %v2063_v44 = vld [vmem:[%s3511_s2] sm:$0xff] }
 0x698   :  { %2820 = vpow2.f32 %v1476_v45 }
 0x6a1   :  { %v2819_v46 = vpop.eup %2818 }
 0x6a2   :  { %v1481_v47 = vsel %vm565_vm3, %v2819_v46, 0.0 }
 0x6a3   :  { %1482 = vadd.xlane.f32.xlu1 %v1481_v47 }
 0x6a5   :  { %v2821_v48 = vpop.eup %2820 }
 0x6a6   :  { %v1487_v49 = vsel %vm565_vm3, %v2821_v48, 0.0 }
 0x6a7   :  { %1488 = vadd.xlane.f32.xlu1 %v1487_v49 }
 0x6b8   :  { %1743 = vrot.lane.b32.xlu1 %v3098_v18, %s2911_s24 }
 0x6bc   :  { %1852 = vrot.lane.b32.xlu1 %v3104_v20, %s2911_s24 }
 0x6c0   :  { %1961 = vrot.lane.b32.xlu1 %v3110_v22, %s2911_s24  ;;  %s2919_s24 = smov 56  }
 0x6f3   :  { %v1480_v16 = vpop.xlane.xlu0 %1479 }
 0x6f4   :  { %2822 = vrcp.f32 %v1480_v16 }
 0x6f7   :  { %v1486_v50 = vpop.xlane.xlu0 %1485 }
 0x6f8   :  { %2824 = vrcp.f32 %v1486_v50 }
 0x6fb   :  { %v1635_v52 = vpop.permute.xlu0 %1634 }
 0x6fc   :  { %2672 = vmatpush3.msra.mxu1 %v1635_v52 }
 0x6fd   :  { %2681 = vmatprep.subr.mxu1 %v2908_v36 }
 0x701   :  { %v2823_v54 = vpop.eup %2822 }
 0x702   :  { %v1491_v56 = vmul.f32 %v2823_v54, %v2815_v25  ;;  %v2070_v25 = vld [vmem:[%s3511_s2 + $0x38] sm:$0xff] }
 0x704   :  { %1601 = vxpose.xlu0.b32.start.end [1/1] (short) (narrow) %v1491_v56, 8 }
 0x705   :  { %v2825_v57 = vpop.eup %2824 }
 0x706   :  { %v1495_v58 = vmul.f32 %v2825_v57, %v2817_v28  ;;  %v2068_v28 = vld [vmem:[%s3511_s2 + $0x28] sm:$0xff] }
 0x708   :  { %1819 = vxpose.xlu0.b32.start.end [1/1] (short) (narrow) %v1495_v58, 8  ;;  %v1498_v18 = vcombine.low %v1491_v56, %v1495_v58  ;;  %v1499_v59 = vcombine.high %v1491_v56, %v1495_v58 }
 0x70a   :  { %v3249_v8 = vrot.slane %v1498_v18, %v3164_v30  ;;  %v3255_v10 = vrot.slane %v1499_v59, %v3164_v30 }
 0x72c   :  { %v1483_v20 = vpop.xlane.xlu1 %1482 }
 0x72d   :  { %2826 = vrcp.f32 %v1483_v20 }
 0x730   :  { %v1489_v60 = vpop.xlane.xlu1 %1488 }
 0x731   :  { %2828 = vrcp.f32 %v1489_v60 }
 0x734   :  { %v1744_v22 = vpop.permute.xlu1 %1743 }
 0x735   :  { %2677 = vmatpush3.msra.mxu0 %v1744_v22 }
 0x736   :  { %2686 = vmatprep.subr.mxu0 %v2908_v36 }
 0x738   :  { %v1853_v19 = vpop.permute.xlu1 %1852 }
 0x73a   :  { %v2827_v61 = vpop.eup %2826 }
 0x73b   :  { %v1493_v62 = vmul.f32 %v2827_v61, %v2819_v46 }
 0x73c   :  { %v1962_v21 = vpop.permute.xlu1 %1961 }
 0x73d   :  { %1710 = vxpose.xlu1.b32.start.end [1/1] (short) (narrow) %v1493_v62, 8 }
 0x73e   :  { %v2829_v63 = vpop.eup %2828 }
 0x73f   :  { %v1497_v3 = vmul.f32 %v2829_v63, %v2821_v48 }
 0x741   :  { %1928 = vxpose.xlu0.b32.start.end [1/1] (short) (narrow) %v1497_v3, 8  ;;  %v1514_v6 = vcombine.low %v1493_v62, %v1497_v3  ;;  %v1515_v7 = vcombine.high %v1493_v62, %v1497_v3 }
 0x743   :  { %v3252_v9 = vrot.slane %v1514_v6, %v3164_v30  ;;  %v3258_v11 = vrot.slane %v1515_v7, %v3164_v30 }
 0x745   :  { %v1531_v12 = vcombine.high %v3249_v8, %v3252_v9  ;;  %v1530_v14 = vcombine.low %v3249_v8, %v3252_v9  ;;  %v1546_v13 = vcombine.low %v3255_v10, %v3258_v11  ;;  %v1547_v15 = vcombine.high %v3255_v10, %v3258_v11 }
 0x780   :  { %v1617_v17 = vpop.trf.xlu0 }
 0x781   :  { %2674 = vmatmul.mubr.msk.f32.vlgmr.msra.gmra.mxu1 %vm565_vm3, %v1617_v17 }
 0x782   :  { %2682 = vmatpush3.msra.mxu1 %v1853_v19  ;;  %2683 = vmatprep.mubr.msk.f32.mxu1 %vm2909_vm1, %v2908_v36 }
 0x784   :  { %v1835_v30 = vpop.trf.xlu0 }
 0x785   :  { %2684 = vmatmul.mubr.msk.f32.vlgmr.msra.gmra.mxu1 %vm565_vm3, %v1835_v30 }
 0x7b9   :  { %v1726_v23 = vpop.trf.xlu1 }
 0x7ba   :  { %2679 = vmatmul.mubr.msk.f32.vlgmr.msra.gmra.mxu0 %vm565_vm3, %v1726_v23 }
 0x7bb   :  { %2687 = vmatpush3.msra.mxu0 %v1962_v21  ;;  %2688 = vmatprep.mubr.msk.f32.mxu0 %vm2909_vm1, %v2908_v36 }
 0x7bc   :  { %2691 = vmatprep.subr.mxu0 %v2070_v25 }
 0x7bd   :  { %v1944_v24 = vpop.trf.xlu0 }
 0x7be   :  { %2689 = vmatmul.mubr.msk.f32.vlgmr.msra.gmra.mxu0 %vm565_vm3, %v1944_v24 }
 0x7bf   :  { %2692 = vmatpush3.msra.mxu0 %v2070_v25 }
 0x7c0   :  { %2693 = vmatprep.subr.mxu0 %v2069_v26 }
 0x7c1   :  { %2694 = vmatpush3.msra.mxu0 %v2069_v26 }
 0x7c2   :  { %2695 = vmatprep.subr.mxu0 %v2068_v28 }
 0x7c3   :  { %2696 = vmatpush3.msra.mxu0 %v2068_v28 }
 0x7c4   :  { %2697 = vmatprep.subr.mxu0 %v2067_v29 }
 0x7c5   :  { %2698 = vmatpush3.msra.mxu0 %v2067_v29 }
 0x7c6   :  { %2699 = vmatprep.subr.mxu0 %v2066_v31 }
 0x7c7   :  { %2700 = vmatpush3.msra.mxu0 %v2066_v31 }
 0x7c8   :  { %2701 = vmatprep.subr.mxu0 %v2065_v32 }
 0x7c9   :  { %2702 = vmatpush3.msra.mxu0 %v2065_v32 }
 0x7ca   :  { %2703 = vmatprep.subr.mxu0 %v2064_v42 }
 0x7cb   :  { %2704 = vmatpush3.msra.mxu0 %v2064_v42 }
 0x7cc   :  { %2705 = vmatprep.subr.mxu0 %v2063_v44 }
 0x7cd   :  { %2706 = vmatpush3.msra.mxu0 %v2063_v44 }
 0x841   :  { %v1706_v43 = vpop.f32.mrf.mxu1 }
 0x842   :  { %2047 = vrot.lane.b32.xlu0 %v1706_v43, %s2912_s25 }
 0x843   :  { %v2675_v45 = vpop.f32.mrf.mxu1 }
 0x845   :  { %v1924_v46 = vpop.f32.mrf.mxu1 }
 0x847   :  { %v2685_v47 = vpop.f32.mrf.mxu1 }
 0x87a   :  { %v1815_v48 = vpop.f32.mrf.mxu0 }
 0x87b   :  { %2049 = vrot.lane.b32.xlu1 %v1815_v48, %s2912_s25 }
 0x87c   :  { %v2680_v49 = vpop.f32.mrf.mxu0 }
 0x87e   :  { %v2033_v16 = vpop.f32.mrf.mxu0 }
 0x87f   :  { %2051 = vrot.lane.b32.xlu1 %v1924_v46, %s2912_s25 }
 0x880   :  { %v2690_v50 = vpop.f32.mrf.mxu0 }
 0x881   :  { %v2914_v50 = vmov 1934713408  }
 0x883   :  { %2053 = vrot.lane.b32.xlu1 %v2033_v16, %s2912_s25 }
 0x8b4   :  { %v2048_v52 = vpop.permute.xlu0 %2047 }
 0x8b5   :  { %v2059_v54 = vsel %vm255_vm2, %v3222_v51, %v2048_v52  ;;  %v2522_v51 = vld [vmem:[%s3514_s5 + $0x2] ss:$0 sm:$0xff]  ;;  %v645_v52 = vunpack.c.l.s4 %v2914_v50 }
 0x8b6   :  { %2707 = vmatprep.mubr.msk.f32.mxu0 %vm65_vm0, %v2059_v54 }
 0x8b7   :  { %v646_v54 = vunpack.c.0.s8 %v645_v52 }
 0x8ed   :  { %v2050_v56 = vpop.permute.xlu1 %2049 }
 0x8ee   :  { %v2060_v57 = vsel %vm255_vm2, %v3224_v53, %v2050_v56  ;;  %v2251_v56 = vld [vmem:[#allocation5 + $0x38] sm:$0xff] }
 0x8ef   :  { %2708 = vmatmul.mubr.msk.f32.vlgmr.msra.gmra.mxu0 %vm65_vm0, %v2060_v57  ;;  %v649_v57 = vsub.s32 %v646_v54, %v3161_v27  ;;  %2713 = vmatprep.subr.mxu0 %v2251_v56 }
 0x8f0   :  { %2714 = vmatpush3.msra.mxu0 %v2251_v56 }
 0x8f1   :  { %v2052_v58 = vpop.permute.xlu1 %2051  ;;  %v657_v27 = vrot.slane %v643_v38, %v649_v57  ;;  %v3379_v33 = vrot.slane %v1530_v14, %v649_v57  ;;  %v1545_v38 = vrot.slane %v1531_v12, %v649_v57  ;;  %v1554_v14 = vrot.slane %v1546_v13, %v649_v57 }
 0x8f2   :  { %v2061_v18 = vsel %vm255_vm2, %v3226_v55, %v2052_v58  ;;  %v2250_v58 = vld [vmem:[#allocation5 + $0x30] sm:$0xff]  ;;  %v1561_v9 = vrot.slane %v1547_v15, %v649_v57  ;;  %v673_v10 = vrot.slane %v659_v41, %v649_v57 }
 0x8f3   :  { %2710 = vmatprep.mubr.msk.f32.mxu0 %vm65_vm0, %v2061_v18  ;;  %2715 = vmatprep.subr.mxu0 %v2250_v58  ;;  %v2249_v18 = vld [vmem:[#allocation5 + $0x28] sm:$0xff]  ;;  %v1563_v8 = vcombine.high %v1545_v38, %v2908_v36  ;;  %v1564_v12 = vcombine.high %v1554_v14, %v2908_v36 }
 0x8f4   :  { %2716 = vmatpush3.msra.mxu0 %v2250_v58  ;;  %v1565_v13 = vcombine.high %v1561_v9, %v2908_v36  ;;  %v677_v15 = vcombine.high %v673_v10, %v2908_v36 }
 0x8f5   :  { %v2054_v59 = vpop.permute.xlu1 %2053  ;;  %2717 = vmatprep.subr.mxu0 %v2249_v18 }
 0x8f6   :  { %v2062_v20 = vsel %vm255_vm2, %v3230_v4, %v2054_v59  ;;  %v3367_v59 = vrot.slane %v642_v39, %v649_v57  ;;  %2718 = vmatpush3.msra.mxu0 %v2249_v18  ;;  %v2245_v39 = vld [vmem:[#allocation5 + $0x8] sm:$0xff] }
 0x8f7   :  { %2711 = vmatmul.mubr.msk.f32.gmra.mxu0 %vm65_vm0, %v2062_v20  ;;  %v2248_v20 = vld [vmem:[#allocation5 + $0x20] sm:$0xff] }
 0x8f8   :  { %2719 = vmatprep.subr.mxu0 %v2248_v20 }
 0x8f9   :  { %2720 = vmatpush3.msra.mxu0 %v2248_v20  ;;  %v2370_v20 = vld [vmem:[%s3513_s4 + $0x68] sm:$0xff] }
 0x9af   :  { %v2709_v60 = vpop.f32.mrf.mxu0 }
 0x9b0   :  { %v2159_v53 = vadd.f32 %v2709_v60, %v2522_v51  ;;  %v2246_v60 = vld [vmem:[#allocation5 + $0x10] sm:$0xff] }
 0x9b1   :  { %v2153_v22 = vpop.f32.mrf.mxu0 }
 0x9b2   :  { %v3320_v61 = vadd.f32 %v2159_v53, %v2977_v2  ;;  %v2154_v62 = vadd.f32 %v2522_v51, %v2153_v22  ;;  %v674_v53 = vcombine.high %v3367_v59, %v2908_v36  ;;  %v675_v22 = vcombine.high %v657_v27, %v2908_v36 }
 0x9b4   :  { %v3323_v55 = vadd.f32 %v2154_v62, %v2973_v0  ;;  %v2179_v63 = vsel %vm65_vm0, %v3320_v61, 0.0  ;;  %v1562_v62 = vcombine.high %v3379_v33, %v2908_v36 }
 0x9b5   :  { %2180 = vadd.xlane.f32.xlu1 %v2179_v63  ;;  %v666_v63 = vrot.slane %v658_v40, %v649_v57  ;;  %v2371_v57 = vld [vmem:[%s3513_s4 + $0x70] sm:$0xff] }
 0x9b6   :  { %v2176_v4 = vsel %vm65_vm0, %v3323_v55, 0.0 }
 0x9b7   :  { %v2712_v3 = vpop.f32.mrf.mxu0  ;;  %2177 = vadd.xlane.f32.xlu0 %v2176_v4  ;;  %v676_v11 = vcombine.high %v666_v63, %v2908_v36 }
 0x9b8   :  { %v2169_v7 = vadd.f32 %v2712_v3, %v2522_v51 }
 0x9b9   :  { %v2163_v6 = vpop.f32.mrf.mxu0 }
 0x9ba   :  { %v2164_v17 = vadd.f32 %v2522_v51, %v2163_v6  ;;  %v3333_v2 = vadd.f32 %v2169_v7, %v2983_v5  ;;  %v2247_v51 = vld [vmem:[#allocation5 + $0x18] sm:$0xff] }
 0x9bb   :  { %2721 = vmatprep.subr.mxu0 %v2247_v51 }
 0x9bc   :  { %v3330_v19 = vadd.f32 %v2164_v17, %v2975_v1  ;;  %v2185_v30 = vsel %vm65_vm0, %v3333_v2, 0.0  ;;  %2722 = vmatpush3.msra.mxu0 %v2247_v51 }
 0x9bd   :  { %2723 = vmatprep.subr.mxu0 %v2246_v60 }
 0x9be   :  { %v2182_v0 = vsel %vm65_vm0, %v3330_v19, 0.0  ;;  %2724 = vmatpush3.msra.mxu0 %v2246_v60 }
 0x9bf   :  { %2183 = vadd.xlane.f32.xlu0 %v2182_v0  ;;  %2725 = vmatprep.subr.mxu0 %v2245_v39 }
 0x9c0   :  { %2726 = vmatpush3.msra.mxu0 %v2245_v39 }
 0x9c1   :  { %2727 = vmatprep.subr.mxu0 %v2244_v34 }
 0x9c2   :  { %2728 = vmatpush3.msra.mxu0 %v2244_v34 }
 0x9c3   :  { %2186 = vadd.xlane.f32.xlu0 %v2185_v30 }
 0xa3e   :  { %v2181_v21 = vpop.xlane.xlu1 %2180 }
 0xa3f   :  { %v2189_v23 = vmul.f32 0.015625, %v2181_v21 }
 0xa40   :  { %v2178_v24 = vpop.xlane.xlu0 %2177 }
 0xa41   :  { %v3340_v25 = vsub.f32 %v3320_v61, %v2189_v23  ;;  %v2188_v26 = vmul.f32 0.015625, %v2178_v24 }
 0xa43   :  { %v3343_v1 = vsub.f32 %v3323_v55, %v2188_v26  ;;  %v2197_v5 = vmul.f32 %v3340_v25, %v3340_v25 }
 0xa45   :  { %v2203_v28 = vsel %vm65_vm0, %v2197_v5, 0.0  ;;  %v2196_v29 = vmul.f32 %v3343_v1, %v3343_v1 }
 0xa46   :  { %2204 = vadd.xlane.f32.xlu1 %v2203_v28 }
 0xa47   :  { %v2200_v31 = vsel %vm65_vm0, %v2196_v29, 0.0 }
 0xa48   :  { %2201 = vadd.xlane.f32.xlu0 %v2200_v31  ;;  %v2184_v32 = vpop.xlane.xlu0 %2183  ;;  %v2527_v31 = vld [vmem:[%s3514_s5 + $0x3] ss:$0 sm:$0xff] }
 0xa49   :  { %v2190_v42 = vmul.f32 0.015625, %v2184_v32 }
 0xa4b   :  { %v3352_v43 = vsub.f32 %v3330_v19, %v2190_v42 }
 0xa4c   :  { %v2187_v44 = vpop.xlane.xlu0 %2186 }
 0xa4d   :  { %v2191_v45 = vmul.f32 0.015625, %v2187_v44  ;;  %v2198_v46 = vmul.f32 %v3352_v43, %v3352_v43 }
 0xa4f   :  { %v3357_v47 = vsub.f32 %v3333_v2, %v2191_v45  ;;  %v2206_v48 = vsel %vm65_vm0, %v2198_v46, 0.0 }
 0xa50   :  { %2207 = vadd.xlane.f32.xlu0 %v2206_v48 }
 0xa51   :  { %v2199_v49 = vmul.f32 %v3357_v47, %v3357_v47 }
 0xa53   :  { %v2209_v16 = vsel %vm65_vm0, %v2199_v49, 0.0 }
 0xa54   :  { %2210 = vadd.xlane.f32.xlu1 %v2209_v16 }
 0xa65   :  { %683 = vrot.lane.b32.xlu1 %v657_v27, %s2915_s1 }
 0xa66   :  { %679 = vrot.lane.b32.xlu0 %v674_v53, %s2906_s28 }
 0xa69   :  { %687 = vrot.lane.b32.xlu1 %v675_v22, %s2916_s20 }
 0xa6a   :  { %1571 = vrot.lane.b32.xlu0 %v1545_v38, %s2915_s1  ;;  %v2368_v38 = vld [vmem:[%s3513_s4 + $0x58] sm:$0xff] }
 0xa6d   :  { %1567 = vrot.lane.b32.xlu1 %v1562_v62, %s2906_s28 }
 0xa6e   :  { %1579 = vrot.lane.b32.xlu0 %v1554_v14, %s2912_s25 }
 0xa71   :  { %1575 = vrot.lane.b32.xlu1 %v1563_v8, %s2916_s20 }
 0xa72   :  { %1587 = vrot.lane.b32.xlu0 %v1561_v9, %s2917_s21 }
 0xa75   :  { %1583 = vrot.lane.b32.xlu1 %v1564_v12, %s2918_s22 }
 0xa76   :  { %691 = vrot.lane.b32.xlu0 %v666_v63, %s2912_s25 }
 0xa79   :  { %1591 = vrot.lane.b32.xlu1 %v1565_v13, %s2919_s24  ;;  %v2366_v13 = vld [vmem:[%s3513_s4 + $0x48] sm:$0xff] }
 0xa7a   :  { %699 = vrot.lane.b32.xlu0 %v673_v10, %s2917_s21 }
 0xa7d   :  { %695 = vrot.lane.b32.xlu1 %v676_v11, %s2918_s22  ;;  %v2365_v11 = vld [vmem:[%s3513_s4 + $0x40] sm:$0xff] }
 0xa81   :  { %703 = vrot.lane.b32.xlu1 %v677_v15, %s2919_s24 }
 0xacf   :  { %v2205_v40 = vpop.xlane.xlu1 %2204 }
 0xad0   :  { %v2213_v4 = vmul.f32 0.015625, %v2205_v40 }
 0xad1   :  { %v2202_v3 = vpop.xlane.xlu0 %2201 }
 0xad2   :  { %v2217_v6 = vadd.f32 1e-05, %v2213_v4  ;;  %v2212_v7 = vmul.f32 0.015625, %v2202_v3  ;;  %v2364_v4 = vld [vmem:[%s3513_s4 + $0x38] sm:$0xff] }
 0xad4   :  { %2830 = vrsqrt.f32 %v2217_v6  ;;  %v2216_v17 = vadd.f32 1e-05, %v2212_v7 }
 0xad6   :  { %2832 = vrsqrt.f32 %v2216_v17  ;;  %v2363_v17 = vld [vmem:[%s3513_s4 + $0x30] sm:$0xff] }
 0xad9   :  { %v2208_v0 = vpop.xlane.xlu0 %2207 }
 0xada   :  { %v2214_v35 = vmul.f32 0.015625, %v2208_v0 }
 0xadc   :  { %v2218_v37 = vadd.f32 1e-05, %v2214_v35  ;;  %v2362_v35 = vld [vmem:[%s3513_s4 + $0x28] sm:$0xff] }
 0xadd   :  { %v2211_v41 = vpop.xlane.xlu1 %2210  ;;  %v680_v30 = vpop.permute.xlu0 %679 }
 0xade   :  { %2834 = vrsqrt.f32 %v2218_v37  ;;  %v2215_v21 = vmul.f32 0.015625, %v2211_v41  ;;  %v706_v36 = vsel %vm565_vm3, %v3367_v59, %v680_v30  ;;  %v2361_v41 = vld [vmem:[%s3513_s4 + $0x20] sm:$0xff]  ;;  %v2360_v30 = vld [vmem:[%s3513_s4 + $0x18] sm:$0xff] }
 0xae0   :  { %v2219_v23 = vadd.f32 1e-05, %v2215_v21  ;;  %v2359_v21 = vld [vmem:[%s3513_s4 + $0x10] sm:$0xff] }
 0xae1   :  { %v2831_v24 = vpop.eup %2830  ;;  %v684_v26 = vpop.permute.xlu1 %683 }
 0xae2   :  { %v2225_v5 = vmul.f32 %v2831_v24, %v3340_v25  ;;  %2836 = vrsqrt.f32 %v2219_v23  ;;  %v708_v28 = vsel %vm707_vm4, %v706_v36, %v684_v26  ;;  %v1572_v29 = vpop.permute.xlu0 %1571  ;;  %v2528_v25 = vld [vmem:[%s3514_s5 + $0x4] ss:$0 sm:$0xff]  ;;  %v2358_v23 = vld [vmem:[%s3513_s4 + $0x8] sm:$0xff] }
 0xae3   :  { %v2833_v32 = vpop.eup %2832  ;;  %v2357_v24 = vld [vmem:[%s3513_s4] sm:$0xff] }
 0xae4   :  { %v2224_v42 = vmul.f32 %v2833_v32, %v3343_v1  ;;  %v2233_v45 = vmul.f32 %v2527_v31, %v2225_v5  ;;  %v2372_v1 = vld [vmem:[%s3513_s4 + $0x78] sm:$0xff]  ;;  %v2529_v5 = vld [vmem:[%s3514_s5 + $0x5] ss:$0 sm:$0xff] }
 0xae5   :  { %v688_v44 = vpop.permute.xlu1 %687  ;;  %2735 = vmatprep.subr.mxu1 %v2372_v1 }
 0xae6   :  { %v710_v46 = vsel %vm709_vm5, %v708_v28, %v688_v44  ;;  %v2232_v48 = vmul.f32 %v2527_v31, %v2224_v42  ;;  %v1580_v49 = vpop.permute.xlu0 %1579  ;;  %v2241_v52 = vadd.f32 %v2528_v25, %v2233_v45  ;;  %2736 = vmatpush3.msra.mxu1 %v2372_v1 }
 0xae7   :  { %2737 = vmatprep.subr.mxu1 %v2371_v57 }
 0xae8   :  { %v2240_v16 = vadd.f32 %v2528_v25, %v2232_v48  ;;  %2738 = vmatpush3.msra.mxu1 %v2371_v57 }
 0xae9   :  { %v1568_v50 = vpop.permute.xlu1 %1567  ;;  %2739 = vmatprep.subr.mxu1 %v2370_v20 }
 0xaea   :  { %v1594_v54 = vsel %vm565_vm3, %v3379_v33, %v1568_v50  ;;  %2729 = vmatprep.mubr.msk.f32.mxu0 %vm65_vm0, %v2240_v16  ;;  %v1588_v51 = vpop.permute.xlu0 %1587  ;;  %2740 = vmatpush3.msra.mxu1 %v2370_v20  ;;  %v2534_v50 = vld [vmem:[%s3514_s5 + $0x6] ss:$0 sm:$0xff]  ;;  %s2878_s5 = scalar_lea.vmem %s2476_s18, 512 }
 0xaeb   :  { %v2835_v56 = vpop.eup %2834  ;;  %2730 = vmatmul.mubr.msk.f32.vlgmr.msra.gmra.mxu0 %vm65_vm0, %v2241_v52  ;;  %v1595_v59 = vsel %vm707_vm4, %v1594_v54, %v1572_v29  ;;  %p2879_p10 = scmp.ne.s32.totalorder %s2476_s18, %s2878_s5  ;;  %p2884_p12 = scmp.lt.s32.totalorder %s2878_s5, %s2878_s5 }
 0xaec   :  { %v2226_v58 = vmul.f32 %v2835_v56, %v3352_v43  ;;  %v2369_v43 = vld [vmem:[%s3513_s4 + $0x60] sm:$0xff] }
 0xaed   :  { %v1576_v18 = vpop.permute.xlu1 %1575  ;;  %2741 = vmatprep.subr.mxu1 %v2369_v43  ;;  %p2885_p13 = por %p2884_p12, %p2883_p11 }
 0xaee   :  { %v1596_v27 = vsel %vm709_vm5, %v1595_v59, %v1576_v18  ;;  %v2234_v60 = vmul.f32 %v2527_v31, %v2226_v58  ;;  %2742 = vmatpush3.msra.mxu1 %v2369_v43  ;;  %v692_v8 = vpop.permute.xlu0 %691 }
 0xaef   :  { %v2837_v53 = vpop.eup %2836  ;;  %v1597_v34 = vsel %vm255_vm2, %v1596_v27, %v1580_v49  ;;  %2743 = vmatprep.subr.mxu1 %v2368_v38  ;;  %v711_v15 = vsel %vm255_vm2, %v710_v46, %v692_v8  ;;  %p2886_p0 = pnand %p2885_p13, %p2879_p10 }
 0xaf0   :  { %v2242_v39 = vadd.f32 %v2528_v25, %v2234_v60  ;;  %v2227_v22 = vmul.f32 %v2837_v53, %v3357_v47  ;;  %v2367_v47 = vld [vmem:[%s3513_s4 + $0x50] sm:$0xff]  ;;  %2744 = vmatpush3.msra.mxu1 %v2368_v38 }
 0xaf1   :  { %v1584_v33 = vpop.permute.xlu1 %1583  ;;  %2745 = vmatprep.subr.mxu1 %v2367_v47 }
 0xaf2   :  { %v1598_v62 = vsel %vm712_vm6, %v1597_v34, %v1584_v33  ;;  %2732 = vmatprep.mubr.msk.f32.mxu0 %vm65_vm0, %v2242_v39  ;;  %v2235_v14 = vmul.f32 %v2527_v31, %v2227_v22  ;;  %2746 = vmatpush3.msra.mxu1 %v2367_v47  ;;  %v700_v3 = vpop.permute.xlu0 %699 }
 0xaf3   :  { %v1599_v63 = vsel %vm714_vm7, %v1598_v62, %v1588_v51  ;;  %2747 = vmatprep.subr.mxu1 %v2366_v13 }
 0xaf4   :  { %v2243_v9 = vadd.f32 %v2528_v25, %v2235_v14  ;;  %2748 = vmatpush3.msra.mxu1 %v2366_v13 }
 0xaf5   :  { %v1592_v12 = vpop.permute.xlu1 %1591  ;;  %2749 = vmatprep.subr.mxu1 %v2365_v11 }
 0xaf6   :  { %2733 = vmatmul.mubr.msk.f32.gmra.mxu0 %vm65_vm0, %v2243_v9  ;;  %v1600_v10 = vsel %vm716_vm8, %v1599_v63, %v1592_v12  ;;  %2750 = vmatpush3.msra.mxu1 %v2365_v11 }
 0xaf7   :  { %2038 = vrot.lane.b32.xlu0 %v1600_v10, %s2910_s23  ;;  %2751 = vmatprep.subr.mxu1 %v2364_v4 }
 0xaf8   :  { %2752 = vmatpush3.msra.mxu1 %v2364_v4 }
 0xaf9   :  { %v696_v40 = vpop.permute.xlu1 %695  ;;  %2753 = vmatprep.subr.mxu1 %v2363_v17 }
 0xafa   :  { %v713_v6 = vsel %vm712_vm6, %v711_v15, %v696_v40  ;;  %2754 = vmatpush3.msra.mxu1 %v2363_v17 }
 0xafb   :  { %v715_v7 = vsel %vm714_vm7, %v713_v6, %v700_v3  ;;  %2755 = vmatprep.subr.mxu1 %v2362_v35 }
 0xafc   :  { %2756 = vmatpush3.msra.mxu1 %v2362_v35 }
 0xafd   :  { %v704_v0 = vpop.permute.xlu1 %703  ;;  %2757 = vmatprep.subr.mxu1 %v2361_v41 }
 0xafe   :  { %v717_v37 = vsel %vm716_vm8, %v715_v7, %v704_v0  ;;  %2758 = vmatpush3.msra.mxu1 %v2361_v41 }
 0xaff   :  { %2759 = vmatprep.subr.mxu1 %v2360_v30 }
 0xb00   :  { %2760 = vmatpush3.msra.mxu1 %v2360_v30 }
 0xb01   :  { %2761 = vmatprep.subr.mxu1 %v2359_v21 }
 0xb02   :  { %2762 = vmatpush3.msra.mxu1 %v2359_v21 }
 0xb03   :  { %2763 = vmatprep.subr.mxu1 %v2358_v23 }
 0xb04   :  { %2764 = vmatpush3.msra.mxu1 %v2358_v23 }
 0xb05   :  { %2765 = vmatprep.subr.mxu1 %v2357_v24 }
 0xb06   :  { %2766 = vmatpush3.msra.mxu1 %v2357_v24 }
 0xb69   :  { %v2039_v36 = vpop.permute.xlu0 %2038 }
 0xb6a   :  { %v2041_v26 = vsel %vm65_vm0, %v717_v37, %v2039_v36 }
 0xb6b   :  { %2042 = vst [vmem:[%s3516_s7] sm:$0xf] %v2041_v26 }
 0xbab   :  { %v2731_v28 = vpop.f32.mrf.mxu0 }
 0xbac   :  { %v2340_v29 = vadd.f32 %v2731_v28, %v2529_v5 }
 0xbad   :  { %v2334_v31 = vpop.f32.mrf.mxu0 }
 0xbae   :  { %v2335_v32 = vadd.f32 %v2529_v5, %v2334_v31  ;;  %v2354_v44 = vmax.f32 %v2340_v29, 0.0 }
 0xbb0   :  { %v2353_v42 = vmax.f32 %v2335_v32, 0.0 }
 0xbb2   :  { %2767 = vmatprep.mubr.f32.mxu1 %v2353_v42 }
 0xbb3   :  { %2768 = vmatmul.mubr.f32.vlgmr.msra.gmra.mxu1 %v2354_v44 }
 0xbb6   :  { %v2734_v45 = vpop.f32.mrf.mxu0 }
 0xbb7   :  { %v2350_v46 = vadd.f32 %v2734_v45, %v2529_v5 }
 0xbb8   :  { %v2344_v25 = vpop.f32.mrf.mxu0 }
 0xbb9   :  { %v2345_v48 = vadd.f32 %v2529_v5, %v2344_v25  ;;  %v2356_v16 = vmax.f32 %v2350_v46, 0.0 }
 0xbbb   :  { %v2355_v49 = vmax.f32 %v2345_v48, 0.0 }
 0xbbd   :  { %2770 = vmatprep.mubr.f32.mxu1 %v2355_v49 }
 0xbbe   :  { %2771 = vmatmul.mubr.f32.gmra.mxu1 %v2356_v16 }
 0xc73   :  { %v2769_v52 = vpop.f32.mrf.mxu1 }
 0xc74   :  { %v2449_v54 = vadd.f32 %v2769_v52, %v2534_v50 }
 0xc75   :  { %v2443_v56 = vpop.f32.mrf.mxu1 }
 0xc76   :  { %v2463_v1 = vadd.f32 %v2449_v54, %v3320_v61  ;;  %v2444_v57 = vadd.f32 %v2534_v50, %v2443_v56 }
 0xc78   :  { %2467 = vst.msk [vmem:[#allocation7 + $0x8] sm:$0xff] %vm65_vm0, %v2463_v1  ;;  %v2462_v58 = vadd.f32 %v2444_v57, %v3323_v55 }
 0xc7a   :  { %2466 = vst.msk [vmem:[#allocation7] sm:$0xff] %vm65_vm0, %v2462_v58 }
 0xc7e   :  { %v2772_v18 = vpop.f32.mrf.mxu1 }
 0xc7f   :  { %v2459_v59 = vadd.f32 %v2772_v18, %v2534_v50 }
 0xc80   :  { %v2453_v20 = vpop.f32.mrf.mxu1 }
 0xc81   :  { %v2465_v51 = vadd.f32 %v2459_v59, %v3333_v2  ;;  %v2454_v27 = vadd.f32 %v2534_v50, %v2453_v20 }
 0xc83   :  { %2469 = vst.msk [vmem:[#allocation7 + $0x18] sm:$0xff] %vm65_vm0, %v2465_v51  ;;  %v2464_v60 = vadd.f32 %v2454_v27, %v3330_v19 }
 0xc85   :  { %2468 = vst.msk [vmem:[#allocation7 + $0x10] sm:$0xff] %vm65_vm0, %v2464_v60 }
 0xc86   :  { %2889 = shalt.err (!%p2886_p0)
}
 0xc87   :  { %2481 = dma.vmem_to_hbm [thread:$0]  %s2476_s18, 512, %s3515_s6, [#allocation4], %s2905_s27, %s2905_s27, %s2906_s28  }
 0xc88   :  { %2902 = dma.done.wait [#allocation4], 512  }
 0xc89   :  { %2903 = vsyncadd [#allocation4], 4294966784 }
 0xc8a   :  { %2489 = vsyncpa [#allocation3], 1 }
 0xc8b   :  { %2490 = vsyncpa [#allocation6], 1 }
 0xc8c   :  { %2491 = vsyncpa [#allocation4], 1 }

</bundles_post_ra>
